<compile_context>
chip_gen: v5e
topology: v5e:2x2
jax: 0.10.0
libtpu: 0.0.40
codegen_flags: <defaults>
</compile_context>

<pallas_src>
import functools

import jax
import jax.numpy as jnp
from jax import lax
from jax.experimental import pallas as pl
from jax.experimental.pallas import tpu as pltpu

EPS = 1e-5
_VMEM_LIMIT = 48 * 1024 * 1024   # within the scoped-VMEM budget on v5e/v6e/v7x


# ----------------------------- Pallas kernels ------------------------------ #

def _conv1_stats_kernel(xs_ref, w_ref, y_ref, s_ref, *, S, Ho, Wo, Cin, C):
    """3x3/stride-S conv over one phase-decomposed padded image + BN-stat accum."""
    b = pl.program_id(0)
    acc = jnp.zeros((Ho * Wo, C), jnp.float32)
    for k in range(9):                      # unrolled: 9 taps -> 9 MXU dots
        dy, dx = k // 3, k % 3
        p = (dy % S) * S + (dx % S)         # phase plane holding rows/cols == dy,dx (mod S)
        qy, qx = dy // S, dx // S           # offset inside that phase plane
        xt = xs_ref[p, qy:qy + Ho, qx:qx + Wo, :].reshape(Ho * Wo, Cin)
        acc += jnp.dot(xt, w_ref[k * Cin:(k + 1) * Cin, :],
                       preferred_element_type=jnp.float32)
    y_ref[...] = acc.reshape(Ho, Wo, C)
    st = jnp.concatenate([jnp.sum(acc, axis=0, keepdims=True),
                          jnp.sum(acc * acc, axis=0, keepdims=True)], axis=0)

    @pl.when(b == 0)
    def _():
        s_ref[...] = st

    @pl.when(b != 0)
    def _():
        s_ref[...] = s_ref[...] + st


def _bn_relu_conv2_stats_kernel(y_ref, sc_ref, sh_ref, w_ref, o_ref, s_ref,
                                apad_ref, *, Ho, Wo, C, cdt):
    """BN1 (folded scale/shift) + ReLU, conv2 (3x3/s1/p1) via a zero-padded VMEM
    scratch (interior stored at sublane-aligned column offset 8), + BN2 stats."""
    b = pl.program_id(0)
    sc = sc_ref[...].reshape(1, 1, C)
    sh = sh_ref[...].reshape(1, 1, C)
    a = jnp.maximum(y_ref[...] * sc + sh, 0.0)                 # (Ho, Wo, C) f32
    apad_ref[...] = jnp.zeros((Ho + 2, Wo + 16, C), cdt)
    apad_ref[1:Ho + 1, 8:8 + Wo, :] = a.astype(cdt)
    acc = jnp.zeros((Ho * Wo, C), jnp.float32)
    for k in range(9):
        dy, dx = k // 3, k % 3
        xt = apad_ref[dy:dy + Ho, 7 + dx:7 + dx + Wo, :].reshape(Ho * Wo, C)
        acc += jnp.dot(xt, w_ref[k * C:(k + 1) * C, :],
                       preferred_element_type=jnp.float32)
    o_ref[...] = acc.reshape(Ho, Wo, C)
    st = jnp.concatenate([jnp.sum(acc, axis=0, keepdims=True),
                          jnp.sum(acc * acc, axis=0, keepdims=True)], axis=0)

    @pl.when(b == 0)
    def _():
        s_ref[...] = st

    @pl.when(b != 0)
    def _():
        s_ref[...] = s_ref[...] + st


def _bn2_add_relu_kernel(y_ref, sc_ref, sh_ref, r_ref, o_ref):
    """Identity shortcut: BN2 + residual add + ReLU (no matmul, no eye(C))."""
    o_ref[...] = jnp.maximum(y_ref[...] * sc_ref[...] + sh_ref[...] + r_ref[...], 0.0)


def _bn2_proj_add_relu_kernel(y_ref, sc_ref, sh_ref, r_ref, w3_ref, b3_ref, o_ref):
    """Projection shortcut: BN2 + (1x1 conv as matmul) + add + ReLU."""
    y = y_ref[...] * sc_ref[...] + sh_ref[...]
    r = jnp.dot(r_ref[...], w3_ref[...], preferred_element_type=jnp.float32) + b3_ref[...]
    o_ref[...] = jnp.maximum(y + r, 0.0)


# ------------------------------- JAX glue ---------------------------------- #

def _w_oihw_to_kc(w_oihw):
    """(Cout, Cin, kh, kw) -> (kh*kw*Cin, Cout), tap order (dy, dx, ci)."""
    co, ci, kh, kw = w_oihw.shape
    return jnp.transpose(w_oihw, (2, 3, 1, 0)).reshape(kh * kw * ci, co)


def _fold_bn(stats, count, gamma, beta):
    """(sum, sumsq) -> folded per-channel scale/shift for y*scale + shift."""
    mean = stats[0] / count
    var = jnp.maximum(stats[1] / count - mean * mean, 0.0)       # biased variance
    scale = gamma * lax.rsqrt(var + EPS)
    shift = beta - mean * scale
    C = gamma.shape[0]
    return scale.reshape(1, C), shift.reshape(1, C)


def init_params(key, input_channels, num_channels, use_1x1_conv):
    ks = jax.random.split(key, 6)
    p = {
        "w1": 0.1 * jax.random.normal(ks[0], (num_channels, input_channels, 3, 3), jnp.float32),
        "b1": 0.1 * jax.random.normal(ks[1], (num_channels,), jnp.float32),
        "g1": jnp.ones((num_channels,), jnp.float32),
        "be1": jnp.zeros((num_channels,), jnp.float32),
        "w2": 0.1 * jax.random.normal(ks[2], (num_channels, num_channels, 3, 3), jnp.float32),
        "b2": 0.1 * jax.random.normal(ks[3], (num_channels,), jnp.float32),
        "g2": jnp.ones((num_channels,), jnp.float32),
        "be2": jnp.zeros((num_channels,), jnp.float32),
    }
    if use_1x1_conv:
        p["w3"] = 0.1 * jax.random.normal(ks[4], (num_channels, input_channels, 1, 1), jnp.float32)
        p["b3"] = 0.1 * jax.random.normal(ks[5], (num_channels,), jnp.float32)
    return p


def residual_block_forward(params, x_nchw, *, use_1x1_conv=False, strides=1,
                           compute_dtype=jnp.bfloat16):
    f32 = jnp.float32
    x = jnp.transpose(x_nchw, (0, 2, 3, 1)).astype(f32)          # NCHW -> NHWC
    N, H, W, Cin = x.shape
    C = params["w1"].shape[0]
    S = int(strides)
    Ho = (H - 1) // S + 1
    Wo = (W - 1) // S + 1
    if not use_1x1_conv:
        assert S == 1 and Cin == C, \
            "identity shortcut requires strides=1 and input_channels == num_channels"
    cdt = compute_dtype
    cp_acc = pltpu.CompilerParams(dimension_semantics=("arbitrary",),
                                  vmem_limit_bytes=_VMEM_LIMIT)
    cp_par = pltpu.CompilerParams(dimension_semantics=("parallel",),
                                  vmem_limit_bytes=_VMEM_LIMIT)

    # Phase-decomposed, zero-padded input: tap (dy,dx) of the stride-S conv
    # becomes a *contiguous* slice of phase plane (dy%S, dx%S) -> no strided
    # loads in-kernel, no 9x im2col expansion in HBM.
    Hh = Ho + 2 // S
    Wh = Wo + 2 // S
    xp = jnp.pad(x, ((0, 0), (1, S * Hh - H - 1), (1, S * Wh - W - 1), (0, 0)))
    phases = [xp[:, i::S, j::S, :] for i in range(S) for j in range(S)]
    xs = jnp.stack(phases, axis=1).reshape(N * S * S, Hh, Wh, Cin).astype(cdt)
    w1k = _w_oihw_to_kc(params["w1"]).astype(cdt)

    # ---- kernel A: conv1 + BN1 statistics (grid over batch; stats accumulate)
    y1_raw, st1 = pl.pallas_call(
        functools.partial(_conv1_stats_kernel, S=S, Ho=Ho, Wo=Wo, Cin=Cin, C=C),
        out_shape=(jax.ShapeDtypeStruct((N, Ho, Wo, C), f32),
                   jax.ShapeDtypeStruct((2, C), f32)),
        grid_spec=pltpu.PrefetchScalarGridSpec(
            num_scalar_prefetch=0,
            grid=(N,),
            in_specs=[pl.BlockSpec((S * S, Hh, Wh, Cin), lambda b: (b, 0, 0, 0)),
                      pl.BlockSpec((9 * Cin, C), lambda b: (0, 0))],
            out_specs=(pl.BlockSpec((None, Ho, Wo, C), lambda b: (b, 0, 0, 0)),
                       pl.BlockSpec((2, C), lambda b: (0, 0)))),
        compiler_params=cp_acc,
    )(xs, w1k)

    cnt = float(N * Ho * Wo)
    sc1, sh1 = _fold_bn(st1, cnt, params["g1"], params["be1"])

    # ---- kernel B: BN1+ReLU fused into conv2, + BN2 statistics
    w2k = _w_oihw_to_kc(params["w2"]).astype(cdt)
    y2_raw, st2 = pl.pallas_call(
        functools.partial(_bn_relu_conv2_stats_kernel, Ho=Ho, Wo=Wo, C=C, cdt=cdt),
        out_shape=(jax.ShapeDtypeStruct((N, Ho, Wo, C), f32),
                   jax.ShapeDtypeStruct((2, C), f32)),
        grid_spec=pltpu.PrefetchScalarGridSpec(
            num_scalar_prefetch=0,
            grid=(N,),
            in_specs=[pl.BlockSpec((None, Ho, Wo, C), lambda b: (b, 0, 0, 0)),
                      pl.BlockSpec((1, C), lambda b: (0, 0)),
                      pl.BlockSpec((1, C), lambda b: (0, 0)),
                      pl.BlockSpec((9 * C, C), lambda b: (0, 0))],
            out_specs=(pl.BlockSpec((None, Ho, Wo, C), lambda b: (b, 0, 0, 0)),
                       pl.BlockSpec((2, C), lambda b: (0, 0))),
            scratch_shapes=[pltpu.VMEM((Ho + 2, Wo + 16, C), cdt)]),
        compiler_params=cp_acc,
    )(y1_raw, sc1, sh1, w2k)

    sc2, sh2 = _fold_bn(st2, cnt, params["g2"], params["be2"])

    # ---- kernel C: BN2 + shortcut + add + ReLU, tiled over rows ("parallel")
    M = N * Ho * Wo
    tile_m = M if M <= 256 else 256
    grid_m = pl.cdiv(M, tile_m)
    y2f = y2_raw.reshape(M, C)
    row_spec = pl.BlockSpec((tile_m, C), lambda i: (i, 0))
    vec_spec = pl.BlockSpec((1, C), lambda i: (0, 0))

    if use_1x1_conv:
        r = x[:, ::S, ::S, :].reshape(M, Cin).astype(cdt)
        w3 = jnp.transpose(params["w3"].reshape(C, Cin)).astype(cdt)   # (Cin, C)
        b3 = params["b3"].reshape(1, C).astype(f32)
        out = pl.pallas_call(
            _bn2_proj_add_relu_kernel,
            out_shape=jax.ShapeDtypeStruct((M, C), f32),
            grid_spec=pltpu.PrefetchScalarGridSpec(
                num_scalar_prefetch=0,
                grid=(grid_m,),
                in_specs=[row_spec, vec_spec, vec_spec,
                          pl.BlockSpec((tile_m, Cin), lambda i: (i, 0)),
                          pl.BlockSpec((Cin, C), lambda i: (0, 0)),
                          vec_spec],
                out_specs=row_spec),
            compiler_params=cp_par,
        )(y2f, sc2, sh2, r, w3, b3)
    else:
        r = x.reshape(M, C)                                            # identity, f32
        out = pl.pallas_call(
            _bn2_add_relu_kernel,
            out_shape=jax.ShapeDtypeStruct((M, C), f32),
            grid_spec=pltpu.PrefetchScalarGridSpec(
                num_scalar_prefetch=0,
                grid=(grid_m,),
                in_specs=[row_spec, vec_spec, vec_spec, row_spec],
                out_specs=row_spec),
            compiler_params=cp_par,
        )(y2f, sc2, sh2, r)

    return out.reshape(N, Ho, Wo, C).transpose(0, 3, 1, 2)             # NHWC -> NCHW


# --------------------------- pure-JAX reference ----------------------------- #

def _conv_ref(x, w, b, stride, pad):
    y = lax.conv_general_dilated(x, w, (stride, stride), [(pad, pad), (pad, pad)],
                                 dimension_numbers=("NCHW", "OIHW", "NCHW"))
    return y + b.reshape(1, -1, 1, 1)


def _bn_ref(x, g, be):
    mean = x.mean(axis=(0, 2, 3), keepdims=True)
    var = ((x - mean) ** 2).mean(axis=(0, 2, 3), keepdims=True)
    return g.reshape(1, -1, 1, 1) * (x - mean) * lax.rsqrt(var + EPS) + be.reshape(1, -1, 1, 1)


def ref_forward(params, x, *, use_1x1_conv=False, strides=1):
    y = jnp.maximum(_bn_ref(_conv_ref(x, params["w1"], params["b1"], strides, 1),
                            params["g1"], params["be1"]), 0.0)
    y = _bn_ref(_conv_ref(y, params["w2"], params["b2"], 1, 1),
                params["g2"], params["be2"])
    r = _conv_ref(x, params["w3"], params["b3"], strides, 0) if use_1x1_conv else x
    return jnp.maximum(y + r, 0.0)


# ----------------------------------- main ----------------------------------- #

if __name__ == "__main__":
    key = jax.random.PRNGKey(0)
    kx, kp1, kp2 = jax.random.split(key, 3)

    N, Cin, C, H, W = 2, 4, 4, 16, 16
    x = jax.random.normal(kx, (N, Cin, H, W), jnp.float32)

    # Config 1: identity shortcut (use_1x1_conv=False, strides=1)
    params = init_params(kp1, Cin, C, use_1x1_conv=False)
    ref1 = ref_forward(params, x, use_1x1_conv=False, strides=1)

    out1_f32 = jax.block_until_ready(residual_block_forward(
        params, x, use_1x1_conv=False, strides=1, compute_dtype=jnp.float32))
    assert out1_f32.shape == (N, C, H, W)
    assert jnp.allclose(out1_f32, ref1, atol=2e-3, rtol=2e-3), \
        float(jnp.max(jnp.abs(out1_f32 - ref1)))

    out1_bf16 = jax.block_until_ready(residual_block_forward(
        params, x, use_1x1_conv=False, strides=1, compute_dtype=jnp.bfloat16))
    assert jnp.allclose(out1_bf16, ref1, atol=6e-2, rtol=6e-2), \
        float(jnp.max(jnp.abs(out1_bf16 - ref1)))

    # Config 2: projection shortcut (use_1x1_conv=True, strides=2, channel change)
    C2 = 8
    params2 = init_params(kp2, Cin, C2, use_1x1_conv=True)
    ref2 = ref_forward(params2, x, use_1x1_conv=True, strides=2)

    out2_f32 = jax.block_until_ready(residual_block_forward(
        params2, x, use_1x1_conv=True, strides=2, compute_dtype=jnp.float32))
    assert out2_f32.shape == (N, C2, H // 2, W // 2)
    assert jnp.allclose(out2_f32, ref2, atol=2e-3, rtol=2e-3), \
        float(jnp.max(jnp.abs(out2_f32 - ref2)))

    out2_bf16 = jax.block_until_ready(residual_block_forward(
        params2, x, use_1x1_conv=True, strides=2, compute_dtype=jnp.bfloat16))
    assert jnp.allclose(out2_bf16, ref2, atol=6e-2, rtol=6e-2), \
        float(jnp.max(jnp.abs(out2_bf16 - ref2)))

    # TODO(synk): BatchNorm running_mean/running_var buffer updates (training
    # side-effect) are not modeled; only the forward output is reproduced.
    print("KERNEL_OK")
</pallas_src>

<mosaic_0001>
module attributes {stable_mosaic.version = 11 : i64} {
  func.func @_conv1_stats_kernel(%arg0: i32, %arg1: memref<1x18x18x4xf32, #tpu.memory_space<vmem>>, %arg2: memref<36x4xf32, #tpu.memory_space<vmem>>, %arg3: memref<1x16x16x4xf32, #tpu.memory_space<vmem>>, %arg4: memref<2x4xf32, #tpu.memory_space<vmem>>) attributes {dimension_semantics = [#tpu.dimension_semantics<arbitrary>], iteration_bounds = array<i64: 2>, scalar_prefetch = 0 : i64, scratch_operands = 0 : i64, tpu.core_type = #tpu.core_type<tc>, window_params = [{transform_indices = @transform_0, window_bounds = array<i64: 1, 18, 18, 4>}, {pipeline_mode = #tpu.pipeline_mode<synchronous>, transform_indices = @transform_1, window_bounds = array<i64: 36, 4>}, {transform_indices = @transform_2, window_bounds = array<i64: 1, 16, 16, 4>}, {pipeline_mode = #tpu.pipeline_mode<synchronous>, transform_indices = @transform_3, window_bounds = array<i64: 2, 4>}]} {
    %cst = arith.constant 0.000000e+00 : f32
    %0 = vector.broadcast %cst : f32 to vector<256x4xf32>
    %c0 = arith.constant 0 : index
    %c0_0 = arith.constant 0 : index
    %c0_1 = arith.constant 0 : index
    %c0_2 = arith.constant 0 : index
    %1 = vector.load %arg1[%c0, %c0_0, %c0_1, %c0_2] : memref<1x18x18x4xf32, #tpu.memory_space<vmem>>, vector<1x16x16x4xf32>
    %2 = vector.shape_cast %1 : vector<1x16x16x4xf32> to vector<16x16x4xf32>
    %3 = vector.shape_cast %2 : vector<16x16x4xf32> to vector<256x4xf32>
    %c0_3 = arith.constant 0 : index
    %c0_4 = arith.constant 0 : index
    %4 = vector.load %arg2[%c0_3, %c0_4] : memref<36x4xf32, #tpu.memory_space<vmem>>, vector<4x4xf32>
    %cst_5 = arith.constant dense<0.000000e+00> : vector<256x4xf32>
    %5 = tpu.matmul %3, %4, %cst_5 {dimension_numbers = #tpu.dot_dimension_numbers<[1], [0], [0], [1], [0, 0, 1, 1], [], []>} : vector<256x4xf32>, vector<4x4xf32>, vector<256x4xf32> -> vector<256x4xf32>
    %6 = arith.addf %0, %5 : vector<256x4xf32>
    %c0_6 = arith.constant 0 : index
    %c0_7 = arith.constant 0 : index
    %c1 = arith.constant 1 : index
    %c0_8 = arith.constant 0 : index
    %7 = vector.load %arg1[%c0_6, %c0_7, %c1, %c0_8] : memref<1x18x18x4xf32, #tpu.memory_space<vmem>>, vector<1x16x16x4xf32>
    %8 = vector.shape_cast %7 : vector<1x16x16x4xf32> to vector<16x16x4xf32>
    %9 = vector.shape_cast %8 : vector<16x16x4xf32> to vector<256x4xf32>
    %c4 = arith.constant 4 : index
    %c0_9 = arith.constant 0 : index
    %10 = vector.load %arg2[%c4, %c0_9] : memref<36x4xf32, #tpu.memory_space<vmem>>, vector<4x4xf32>
    %cst_10 = arith.constant dense<0.000000e+00> : vector<256x4xf32>
    %11 = tpu.matmul %9, %10, %cst_10 {dimension_numbers = #tpu.dot_dimension_numbers<[1], [0], [0], [1], [0, 0, 1, 1], [], []>} : vector<256x4xf32>, vector<4x4xf32>, vector<256x4xf32> -> vector<256x4xf32>
    %12 = arith.addf %6, %11 : vector<256x4xf32>
    %c0_11 = arith.constant 0 : index
    %c0_12 = arith.constant 0 : index
    %c2 = arith.constant 2 : index
    %c0_13 = arith.constant 0 : index
    %13 = vector.load %arg1[%c0_11, %c0_12, %c2, %c0_13] : memref<1x18x18x4xf32, #tpu.memory_space<vmem>>, vector<1x16x16x4xf32>
    %14 = vector.shape_cast %13 : vector<1x16x16x4xf32> to vector<16x16x4xf32>
    %15 = vector.shape_cast %14 : vector<16x16x4xf32> to vector<256x4xf32>
    %c8 = arith.constant 8 : index
    %c0_14 = arith.constant 0 : index
    %16 = vector.load %arg2[%c8, %c0_14] : memref<36x4xf32, #tpu.memory_space<vmem>>, vector<4x4xf32>
    %cst_15 = arith.constant dense<0.000000e+00> : vector<256x4xf32>
    %17 = tpu.matmul %15, %16, %cst_15 {dimension_numbers = #tpu.dot_dimension_numbers<[1], [0], [0], [1], [0, 0, 1, 1], [], []>} : vector<256x4xf32>, vector<4x4xf32>, vector<256x4xf32> -> vector<256x4xf32>
    %18 = arith.addf %12, %17 : vector<256x4xf32>
    %c0_16 = arith.constant 0 : index
    %c1_17 = arith.constant 1 : index
    %c0_18 = arith.constant 0 : index
    %c0_19 = arith.constant 0 : index
    %19 = vector.load %arg1[%c0_16, %c1_17, %c0_18, %c0_19] : memref<1x18x18x4xf32, #tpu.memory_space<vmem>>, vector<1x16x16x4xf32>
    %20 = vector.shape_cast %19 : vector<1x16x16x4xf32> to vector<16x16x4xf32>
    %21 = vector.shape_cast %20 : vector<16x16x4xf32> to vector<256x4xf32>
    %c12 = arith.constant 12 : index
    %c0_20 = arith.constant 0 : index
    %22 = vector.load %arg2[%c12, %c0_20] : memref<36x4xf32, #tpu.memory_space<vmem>>, vector<4x4xf32>
    %cst_21 = arith.constant dense<0.000000e+00> : vector<256x4xf32>
    %23 = tpu.matmul %21, %22, %cst_21 {dimension_numbers = #tpu.dot_dimension_numbers<[1], [0], [0], [1], [0, 0, 1, 1], [], []>} : vector<256x4xf32>, vector<4x4xf32>, vector<256x4xf32> -> vector<256x4xf32>
    %24 = arith.addf %18, %23 : vector<256x4xf32>
    %c0_22 = arith.constant 0 : index
    %c1_23 = arith.constant 1 : index
    %c1_24 = arith.constant 1 : index
    %c0_25 = arith.constant 0 : index
    %25 = vector.load %arg1[%c0_22, %c1_23, %c1_24, %c0_25] : memref<1x18x18x4xf32, #tpu.memory_space<vmem>>, vector<1x16x16x4xf32>
    %26 = vector.shape_cast %25 : vector<1x16x16x4xf32> to vector<16x16x4xf32>
    %27 = vector.shape_cast %26 : vector<16x16x4xf32> to vector<256x4xf32>
    %c16 = arith.constant 16 : index
    %c0_26 = arith.constant 0 : index
    %28 = vector.load %arg2[%c16, %c0_26] : memref<36x4xf32, #tpu.memory_space<vmem>>, vector<4x4xf32>
    %cst_27 = arith.constant dense<0.000000e+00> : vector<256x4xf32>
    %29 = tpu.matmul %27, %28, %cst_27 {dimension_numbers = #tpu.dot_dimension_numbers<[1], [0], [0], [1], [0, 0, 1, 1], [], []>} : vector<256x4xf32>, vector<4x4xf32>, vector<256x4xf32> -> vector<256x4xf32>
    %30 = arith.addf %24, %29 : vector<256x4xf32>
    %c0_28 = arith.constant 0 : index
    %c1_29 = arith.constant 1 : index
    %c2_30 = arith.constant 2 : index
    %c0_31 = arith.constant 0 : index
    %31 = vector.load %arg1[%c0_28, %c1_29, %c2_30, %c0_31] : memref<1x18x18x4xf32, #tpu.memory_space<vmem>>, vector<1x16x16x4xf32>
    %32 = vector.shape_cast %31 : vector<1x16x16x4xf32> to vector<16x16x4xf32>
    %33 = vector.shape_cast %32 : vector<16x16x4xf32> to vector<256x4xf32>
    %c20 = arith.constant 20 : index
    %c0_32 = arith.constant 0 : index
    %34 = vector.load %arg2[%c20, %c0_32] : memref<36x4xf32, #tpu.memory_space<vmem>>, vector<4x4xf32>
    %cst_33 = arith.constant dense<0.000000e+00> : vector<256x4xf32>
    %35 = tpu.matmul %33, %34, %cst_33 {dimension_numbers = #tpu.dot_dimension_numbers<[1], [0], [0], [1], [0, 0, 1, 1], [], []>} : vector<256x4xf32>, vector<4x4xf32>, vector<256x4xf32> -> vector<256x4xf32>
    %36 = arith.addf %30, %35 : vector<256x4xf32>
    %c0_34 = arith.constant 0 : index
    %c2_35 = arith.constant 2 : index
    %c0_36 = arith.constant 0 : index
    %c0_37 = arith.constant 0 : index
    %37 = vector.load %arg1[%c0_34, %c2_35, %c0_36, %c0_37] : memref<1x18x18x4xf32, #tpu.memory_space<vmem>>, vector<1x16x16x4xf32>
    %38 = vector.shape_cast %37 : vector<1x16x16x4xf32> to vector<16x16x4xf32>
    %39 = vector.shape_cast %38 : vector<16x16x4xf32> to vector<256x4xf32>
    %c24 = arith.constant 24 : index
    %c0_38 = arith.constant 0 : index
    %40 = vector.load %arg2[%c24, %c0_38] : memref<36x4xf32, #tpu.memory_space<vmem>>, vector<4x4xf32>
    %cst_39 = arith.constant dense<0.000000e+00> : vector<256x4xf32>
    %41 = tpu.matmul %39, %40, %cst_39 {dimension_numbers = #tpu.dot_dimension_numbers<[1], [0], [0], [1], [0, 0, 1, 1], [], []>} : vector<256x4xf32>, vector<4x4xf32>, vector<256x4xf32> -> vector<256x4xf32>
    %42 = arith.addf %36, %41 : vector<256x4xf32>
    %c0_40 = arith.constant 0 : index
    %c2_41 = arith.constant 2 : index
    %c1_42 = arith.constant 1 : index
    %c0_43 = arith.constant 0 : index
    %43 = vector.load %arg1[%c0_40, %c2_41, %c1_42, %c0_43] : memref<1x18x18x4xf32, #tpu.memory_space<vmem>>, vector<1x16x16x4xf32>
    %44 = vector.shape_cast %43 : vector<1x16x16x4xf32> to vector<16x16x4xf32>
    %45 = vector.shape_cast %44 : vector<16x16x4xf32> to vector<256x4xf32>
    %c28 = arith.constant 28 : index
    %c0_44 = arith.constant 0 : index
    %46 = vector.load %arg2[%c28, %c0_44] : memref<36x4xf32, #tpu.memory_space<vmem>>, vector<4x4xf32>
    %cst_45 = arith.constant dense<0.000000e+00> : vector<256x4xf32>
    %47 = tpu.matmul %45, %46, %cst_45 {dimension_numbers = #tpu.dot_dimension_numbers<[1], [0], [0], [1], [0, 0, 1, 1], [], []>} : vector<256x4xf32>, vector<4x4xf32>, vector<256x4xf32> -> vector<256x4xf32>
    %48 = arith.addf %42, %47 : vector<256x4xf32>
    %c0_46 = arith.constant 0 : index
    %c2_47 = arith.constant 2 : index
    %c2_48 = arith.constant 2 : index
    %c0_49 = arith.constant 0 : index
    %49 = vector.load %arg1[%c0_46, %c2_47, %c2_48, %c0_49] : memref<1x18x18x4xf32, #tpu.memory_space<vmem>>, vector<1x16x16x4xf32>
    %50 = vector.shape_cast %49 : vector<1x16x16x4xf32> to vector<16x16x4xf32>
    %51 = vector.shape_cast %50 : vector<16x16x4xf32> to vector<256x4xf32>
    %c32 = arith.constant 32 : index
    %c0_50 = arith.constant 0 : index
    %52 = vector.load %arg2[%c32, %c0_50] : memref<36x4xf32, #tpu.memory_space<vmem>>, vector<4x4xf32>
    %cst_51 = arith.constant dense<0.000000e+00> : vector<256x4xf32>
    %53 = tpu.matmul %51, %52, %cst_51 {dimension_numbers = #tpu.dot_dimension_numbers<[1], [0], [0], [1], [0, 0, 1, 1], [], []>} : vector<256x4xf32>, vector<4x4xf32>, vector<256x4xf32> -> vector<256x4xf32>
    %54 = arith.addf %48, %53 : vector<256x4xf32>
    %55 = vector.shape_cast %54 : vector<256x4xf32> to vector<16x16x4xf32>
    %c0_52 = arith.constant 0 : index
    %c0_53 = arith.constant 0 : index
    %c0_54 = arith.constant 0 : index
    %c0_55 = arith.constant 0 : index
    %56 = vector.load %arg3[%c0_52, %c0_53, %c0_54, %c0_55] : memref<1x16x16x4xf32, #tpu.memory_space<vmem>>, vector<1x16x16x4xf32>
    %57 = vector.shape_cast %56 : vector<1x16x16x4xf32> to vector<16x16x4xf32>
    %58 = vector.shape_cast %55 : vector<16x16x4xf32> to vector<1x16x16x4xf32>
    tpu.vector_store %arg3[%c0_52, %c0_53, %c0_54, %c0_55], %58 {strides = array<i32>} : memref<1x16x16x4xf32, #tpu.memory_space<vmem>>, vector<1x16x16x4xf32>,
    %cst_56 = arith.constant dense<0.000000e+00> : vector<4xf32>
    %59 = vector.multi_reduction <add>, %54, %cst_56 [0] : vector<256x4xf32> to vector<4xf32>
    %60 = vector.shape_cast %59 : vector<4xf32> to vector<1x4xf32>
    %61 = arith.mulf %54, %54 : vector<256x4xf32>
    %cst_57 = arith.constant dense<0.000000e+00> : vector<4xf32>
    %62 = vector.multi_reduction <add>, %61, %cst_57 [0] : vector<256x4xf32> to vector<4xf32>
    %63 = vector.shape_cast %62 : vector<4xf32> to vector<1x4xf32>
    %64 = tpu.concatenate %60, %63 in 0 : vector<1x4xf32>, vector<1x4xf32> -> vector<2x4xf32>
    %c0_i32 = arith.constant 0 : i32
    %65 = arith.cmpi eq, %arg0, %c0_i32 : i32
    %66 = arith.extui %65 : i1 to i32
    %c0_i32_58 = arith.constant 0 : i32
    %67 = arith.cmpi ne, %66, %c0_i32_58 : i32
    scf.if %67 {
      %c0_61 = arith.constant 0 : index
      %c0_62 = arith.constant 0 : index
      %71 = vector.load %arg4[%c0_61, %c0_62] : memref<2x4xf32, #tpu.memory_space<vmem>>, vector<2x4xf32>
      tpu.vector_store %arg4[%c0_61, %c0_62], %64 {strides = array<i32>} : memref<2x4xf32, #tpu.memory_space<vmem>>, vector<2x4xf32>,
    } else {
    }
    %c0_i32_59 = arith.constant 0 : i32
    %68 = arith.cmpi ne, %arg0, %c0_i32_59 : i32
    %69 = arith.extui %68 : i1 to i32
    %c0_i32_60 = arith.constant 0 : i32
    %70 = arith.cmpi ne, %69, %c0_i32_60 : i32
    scf.if %70 {
      %c0_61 = arith.constant 0 : index
      %c0_62 = arith.constant 0 : index
      %71 = vector.load %arg4[%c0_61, %c0_62] : memref<2x4xf32, #tpu.memory_space<vmem>>, vector<2x4xf32>
      %72 = arith.addf %71, %64 : vector<2x4xf32>
      %c0_63 = arith.constant 0 : index
      %c0_64 = arith.constant 0 : index
      %73 = vector.load %arg4[%c0_63, %c0_64] : memref<2x4xf32, #tpu.memory_space<vmem>>, vector<2x4xf32>
      tpu.vector_store %arg4[%c0_63, %c0_64], %72 {strides = array<i32>} : memref<2x4xf32, #tpu.memory_space<vmem>>, vector<2x4xf32>,
    } else {
    }
    return
  }
  func.func @transform_0(%arg0: i32) -> (i32, i32, i32, i32) {
    %c0_i32 = arith.constant 0 : i32
    %c0_i32_0 = arith.constant 0 : i32
    %c0_i32_1 = arith.constant 0 : i32
    %c0_i32_2 = arith.constant 0 : i32
    return %arg0, %c0_i32, %c0_i32_0, %c0_i32_1 : i32, i32, i32, i32
  }
  func.func @transform_1(%arg0: i32) -> (i32, i32) {
    %c0_i32 = arith.constant 0 : i32
    %c0_i32_0 = arith.constant 0 : i32
    %c0_i32_1 = arith.constant 0 : i32
    return %c0_i32, %c0_i32_0 : i32, i32
  }
  func.func @transform_2(%arg0: i32) -> (i32, i32, i32, i32) {
    %c0_i32 = arith.constant 0 : i32
    %c0_i32_0 = arith.constant 0 : i32
    %c0_i32_1 = arith.constant 0 : i32
    %c0_i32_2 = arith.constant 0 : i32
    return %arg0, %c0_i32, %c0_i32_0, %c0_i32_1 : i32, i32, i32, i32
  }
  func.func @transform_3(%arg0: i32) -> (i32, i32) {
    %c0_i32 = arith.constant 0 : i32
    %c0_i32_0 = arith.constant 0 : i32
    %c0_i32_1 = arith.constant 0 : i32
    return %c0_i32, %c0_i32_0 : i32, i32
  }
}

</mosaic_0001>

<bundles_post_ra>
// kernel: tpu_custom_call.1
= control target key start
LH: loop header
LB: loop body
LE: loop exit
PB: predicated region body
PF: predicated region fallthrough
CT: control target
= control target key end

     0   :  { %9 = vsyncpa [#allocation3], 0  ;;  %s3486_s12 = smov 0   ;;  %s4664_s0 = inlined_call_operand.vmem [shape: f32[2,18,18,4], index: 0, kind: input, shape index: {}]   ;;  %s4665_s1 = inlined_call_operand.vmem [shape: f32[36,4], index: 1, kind: input, shape index: {}]   ;;  %s4666_s2 = inlined_call_operand.vmem [shape: f32[2,16,16,4], index: 2, kind: output, shape index: {0}]   ;;  %s4667_s3 = inlined_call_operand.hbm [shape: f32[2,4], index: 3, kind: output, shape index: {1}]  }
   0x1 LB: > { %s3492_s13 = sadd.s32 4294967295, %s3463_s12   ;;  %p2906_p0 = scmp.ge.s32.totalorder %s3463_s12, 1  ;;  %s3463_s12 = sphi %s3486_s12, %s15_s12  }
   0x2   : > { %p136_p1 = scmp.lt.s32.totalorder %s3463_s12, 3 }
   0x4   : > { %p137_p2 = pnand %p2906_p0, %p136_p1 }
   0x6   : > { %140 = sbr.rel (%p137_p2) target bundleno = 763 (0x2fb), region = 28 }
   0xb   : > { %v235_v0 = vld [vmem:[%s4665_s1 + $0x4] sm:$0xf]  ;;  %vm333_vm0 = vcmask 1043456   ;;  %p160_p3 = scmp.lt.s32.totalorder %s3492_s13, 1  ;;  %v694_v1 = vld [vmem:[%s4665_s1 + $0x8] sm:$0xf] }
   0xc   : > { %3406 = vmatpush.msk.msra.mxu1 %vm333_vm0, %v235_v0  ;;  %3407 = vmatpush.msk.msra.mxu2 %vm333_vm0, %v235_v0  ;;  %v972_v2 = vld [vmem:[%s4665_s1 + $0xc] sm:$0xf]  ;;  %v202_v3 = vld [vmem:[%s4665_s1] sm:$0xf]  ;;  %v1249_v4 = vld [vmem:[%s4665_s1 + $0x10] sm:$0xf] }
   0xd   : > { %s3512_s22 = scalar_select %p160_p3, %s3492_s13, 1  ;;  %3408 = vmatpush.msk.msra.mxu3 %vm333_vm0, %v235_v0  ;;  %2910 = vmatpush.msk.msra.mxu0 %vm333_vm0, %v235_v0  ;;  %vm236_vm1 = vcmask 31744   ;;  %v1804_v25 = vld [vmem:[%s4665_s1 + $0x18] sm:$0xf]  ;;  %v2081_v26 = vld [vmem:[%s4665_s1 + $0x1c] sm:$0xf] }
   0xe   : > { %2976 = vmatpush.msk.msrb.mxu2 %vm333_vm0, %v694_v1  ;;  %2943 = vmatpush.msk.msrb.mxu1 %vm333_vm0, %v202_v3  ;;  %v1526_v27 = vld [vmem:[%s4665_s1 + $0x14] sm:$0xf]  ;;  %v2358_v32 = vld [vmem:[%s4665_s1 + $0x20] sm:$0xf]  ;;  %vm2805_vm2 = vcmask 1040384   ;;  %p3399_p4 = scmp.ne.s32.totalorder %s3492_s13, 0 }
   0xf   : > { %3041 = vmatpush.msk.msrb.mxu3 %vm333_vm0, %v972_v2  ;;  %s3409_s25 = smul.u32 432, %s3512_s22  ;;  %3106 = vmatpush.msk.msrb.mxu0 %vm333_vm0, %v1249_v4  ;;  %s3405_s10 = sshll.u32 %s3512_s22, 8 }
  0x10   : > { %s4382_s15 = scalar_lea.vmem %s4666_s2, %s3405_s10 }
  0x11   : > { %s3527_s28 = scalar_lea.vmem %s4664_s0, %s3409_s25 }
  0x12   : > { %v3530_v5 = vld [vmem:[%s3527_s28 + $0x61] sm:$0xff]  ;;  %v3547_v9 = vld [vmem:[%s3527_s28 + $0x69] sm:$0xff]  ;;  %v3564_v13 = vld [vmem:[%s3527_s28 + $0x79] sm:$0xff] }
  0x13   : > { %v3533_v6 = vld [vmem:[%s3527_s28 + $0xc1] sm:$0xff]  ;;  %2919 = vmatmul.msk.f32.vlgmr.msra.gmra.mxu1 %vm236_vm1, %v3530_v5  ;;  %v3550_v10 = vld [vmem:[%s3527_s28 + $0xc9] sm:$0xff]  ;;  %v3567_v14 = vld [vmem:[%s3527_s28 + $0xd9] sm:$0xff] }
  0x14   : > { %v3536_v7 = vld [vmem:[%s3527_s28 + $0x121] sm:$0xff]  ;;  %2927 = vmatmul.msk.f32.vlgmr.msra.gmra.mxu2 %vm236_vm1, %v3533_v6  ;;  %v3553_v11 = vld [vmem:[%s3527_s28 + $0x129] sm:$0xff]  ;;  %v3570_v15 = vld [vmem:[%s3527_s28 + $0x139] sm:$0xff]  ;;  %3171 = vmatpush.msk.msra.mxu1 %vm333_vm0, %v1526_v27 }
  0x15   : > { %v203_v8 = vld [vmem:[%s3527_s28 + $0x1] sm:$0xff]  ;;  %2935 = vmatmul.msk.f32.vlgmr.msra.gmra.mxu3 %vm236_vm1, %v3536_v7  ;;  %v204_v12 = vld [vmem:[%s3527_s28 + $0x9] sm:$0xff]  ;;  %v205_v16 = vld [vmem:[%s3527_s28 + $0x19] sm:$0xff]  ;;  %3236 = vmatpush.msk.msra.mxu2 %vm333_vm0, %v1804_v25 }
  0x16   : > { %2911 = vmatmul.msk.f32.vlgmr.msra.gmra.mxu0 %vm236_vm1, %v203_v8  ;;  %v3581_v17 = vld [vmem:[%s3527_s28 + $0x81] sm:$0xff]  ;;  %v3598_v21 = vld [vmem:[%s3527_s28 + $0x91] sm:$0xff]  ;;  %3301 = vmatpush.msk.msra.mxu3 %vm333_vm0, %v2081_v26  ;;  %v3630_v28 = vld [vmem:[%s3527_s28 + $0x99] sm:$0xff] }
  0x17   : > { %v3584_v18 = vld [vmem:[%s3527_s28 + $0xe1] sm:$0xff]  ;;  %v3601_v22 = vld [vmem:[%s3527_s28 + $0xf1] sm:$0xff]  ;;  %v3633_v29 = vld [vmem:[%s3527_s28 + $0xf9] sm:$0xff]  ;;  %3366 = vmatpush.msk.msra.mxu0 %vm333_vm0, %v2358_v32 }
  0x18   : > { %v3587_v19 = vld [vmem:[%s3527_s28 + $0x141] sm:$0xff]  ;;  %v3604_v23 = vld [vmem:[%s3527_s28 + $0x151] sm:$0xff]  ;;  %v3636_v30 = vld [vmem:[%s3527_s28 + $0x159] sm:$0xff] }
  0x19   : > { %v206_v20 = vld [vmem:[%s3527_s28 + $0x21] sm:$0xff]  ;;  %v3607_v24 = vld [vmem:[%s3527_s28 + $0x31] sm:$0xff]  ;;  %v3639_v31 = vld [vmem:[%s3527_s28 + $0x39] sm:$0xff] }
  0x1a   : > { %v3654_v33 = vld [vmem:[%s3527_s28 + $0xa9] sm:$0xff]  ;;  %v3674_v37 = vld [vmem:[%s3527_s28 + $0xb1] sm:$0xff]  ;;  %v170_v41 = vld [vmem:[%s3527_s28] sm:$0xff] }
  0x1b   : > { %2920 = vmatmul.msk.f32.gmra.mxu1 %vm236_vm1, %v3547_v9  ;;  %v3657_v34 = vld [vmem:[%s3527_s28 + $0x109] sm:$0xff]  ;;  %v3677_v38 = vld [vmem:[%s3527_s28 + $0x111] sm:$0xff]  ;;  %v3010_v46 = vld [vmem:[%s3527_s28 + $0x20] sm:$0xff] }
  0x1c   : > { %2928 = vmatmul.msk.f32.gmra.mxu2 %vm236_vm1, %v3550_v10  ;;  %v3660_v35 = vld [vmem:[%s3527_s28 + $0x169] sm:$0xff]  ;;  %v3680_v39 = vld [vmem:[%s3527_s28 + $0x171] sm:$0xff]  ;;  %v3708_v47 = vld [vmem:[%s3527_s28 + $0x1a] sm:$0xff] }
  0x1d   : > { %2936 = vmatmul.msk.f32.gmra.mxu3 %vm236_vm1, %v3553_v11  ;;  %v3663_v36 = vld [vmem:[%s3527_s28 + $0x49] sm:$0xff]  ;;  %v3683_v40 = vld [vmem:[%s3527_s28 + $0x51] sm:$0xff]  ;;  %v3748_v53 = vld [vmem:[%s3527_s28 + $0x3a] sm:$0xff] }
  0x1e   : > { %2912 = vmatmul.msk.f32.gmra.mxu0 %vm236_vm1, %v204_v12  ;;  %v662_v42 = vld [vmem:[%s3527_s28 + $0x2] sm:$0xff]  ;;  %v3009_v43 = vld [vmem:[%s3527_s28 + $0x18] sm:$0xff]  ;;  %v663_v45 = vld [vmem:[%s3527_s28 + $0xa] sm:$0xff] }
  0x1f   : > { %v171_v44 = vld [vmem:[%s3527_s28 + $0x8] sm:$0xff]  ;;  %v3711_v48 = vld [vmem:[%s3527_s28 + $0x30] sm:$0xff]  ;;  %v3724_v50 = vld [vmem:[%s3527_s28 + $0x38] sm:$0xff] }
  0x20   : > { %v3721_v49 = vld [vmem:[%s3527_s28 + $0x22] sm:$0xff]  ;;  %v3734_v51 = vld [vmem:[%s3527_s28 + $0x32] sm:$0xff]  ;;  %v3762_v55 = vld [vmem:[%s3527_s28 + $0x4a] sm:$0xff] }
  0x21   : > { %v3737_v52 = vld [vmem:[%s3527_s28 + $0x48] sm:$0xff]  ;;  %v3751_v54 = vld [vmem:[%s3527_s28 + $0x50] sm:$0xff]  ;;  %v3765_v56 = vld [vmem:[%s3527_s28 + $0x60] sm:$0xff] }
  0x22   : > { %v3776_v57 = vld [vmem:[%s3527_s28 + $0x52] sm:$0xff]  ;;  %v3779_v58 = vld [vmem:[%s3527_s28 + $0x68] sm:$0xff]  ;;  %v3817_v3 = vld [vmem:[%s3527_s28 + $0x80] sm:$0xff] }
  0x23   : > { %2921 = vmatmul.msk.f32.gmra.mxu1 %vm236_vm1, %v3564_v13  ;;  %4692 = vst [vmem:[#allocation5_spill] sm:$0xff] %v3779_v58  ;;  %v3792_v60 = vld [vmem:[%s3527_s28 + $0x62] sm:$0xff]  ;;  %v3795_v61 = vld [vmem:[%s3527_s28 + $0x78] sm:$0xff]  ;;  %v3814_v2 = vld [vmem:[%s3527_s28 + $0x6a] sm:$0xff] }
  0x24   : > { %2929 = vmatmul.msk.f32.gmra.mxu2 %vm236_vm1, %v3567_v14  ;;  %4693 = vst [vmem:[#allocation6_spill] sm:$0xff] %v3795_v61  ;;  %v3836_v12 = vld [vmem:[%s3527_s28 + $0x7a] sm:$0xff]  ;;  %v3858_v26 = vld [vmem:[%s3527_s28 + $0x82] sm:$0xff] }
  0x25   : > { %2937 = vmatmul.msk.f32.gmra.mxu3 %vm236_vm1, %v3570_v15  ;;  %4695 = vst [vmem:[#allocation8_spill] sm:$0xff] %v3814_v2  ;;  %v3861_v27 = vld [vmem:[%s3527_s28 + $0x98] sm:$0xff] }
  0x26   : > { %2913 = vmatmul.msk.f32.gmra.mxu0 %vm236_vm1, %v205_v16  ;;  %4696 = vst [vmem:[#allocation9_spill] sm:$0xff] %v3817_v3 }
  0x27   : > { %4698 = vst [vmem:[#allocation11_spill] sm:$0xff] %v3836_v12 }
  0x28   : > { %4701 = vst [vmem:[#allocation14_spill] sm:$0xff] %v3858_v26 }
  0x29   : > { %4702 = vst [vmem:[#allocation15_spill] sm:$0xff] %v3861_v27 }
  0x2b   : > { %2922 = vmatmul.msk.f32.gmra.mxu1 %vm236_vm1, %v3581_v17 }
  0x2c   : > { %2930 = vmatmul.msk.f32.gmra.mxu2 %vm236_vm1, %v3584_v18 }
  0x2d   : > { %2938 = vmatmul.msk.f32.gmra.mxu3 %vm236_vm1, %v3587_v19 }
  0x2e   : > { %2914 = vmatmul.msk.f32.gmra.mxu0 %vm236_vm1, %v206_v20 }
  0x33   : > { %2923 = vmatmul.msk.f32.gmra.mxu1 %vm236_vm1, %v3598_v21 }
  0x34   : > { %2931 = vmatmul.msk.f32.gmra.mxu2 %vm236_vm1, %v3601_v22 }
  0x35   : > { %2939 = vmatmul.msk.f32.gmra.mxu3 %vm236_vm1, %v3604_v23 }
  0x36   : > { %2915 = vmatmul.msk.f32.gmra.mxu0 %vm236_vm1, %v3607_v24 }
  0x3b   : > { %2924 = vmatmul.msk.f32.gmra.mxu1 %vm236_vm1, %v3630_v28 }
  0x3c   : > { %2932 = vmatmul.msk.f32.gmra.mxu2 %vm236_vm1, %v3633_v29 }
  0x3d   : > { %2940 = vmatmul.msk.f32.gmra.mxu3 %vm236_vm1, %v3636_v30 }
  0x3e   : > { %2916 = vmatmul.msk.f32.gmra.mxu0 %vm236_vm1, %v3639_v31 }
  0x43   : > { %2925 = vmatmul.msk.f32.gmra.mxu1 %vm236_vm1, %v3654_v33 }
  0x44   : > { %2933 = vmatmul.msk.f32.gmra.mxu2 %vm236_vm1, %v3657_v34 }
  0x45   : > { %2941 = vmatmul.msk.f32.gmra.mxu3 %vm236_vm1, %v3660_v35 }
  0x46   : > { %2917 = vmatmul.msk.f32.gmra.mxu0 %vm236_vm1, %v3663_v36 }
  0x4b   : > { %2926 = vmatmul.msk.f32.gmra.mxu1 %vm236_vm1, %v3674_v37 }
  0x4c   : > { %2934 = vmatmul.msk.f32.gmra.mxu2 %vm236_vm1, %v3677_v38 }
  0x4d   : > { %2942 = vmatmul.msk.f32.gmra.mxu3 %vm236_vm1, %v3680_v39 }
  0x4e   : > { %2918 = vmatmul.msk.f32.gmra.mxu0 %vm236_vm1, %v3683_v40 }
  0x53   : > { %2944 = vmatmul.msk.f32.vlgmr.msrb.gmra.mxu1 %vm236_vm1, %v170_v41 }
  0x54   : > { %2977 = vmatmul.msk.f32.vlgmr.msrb.gmra.mxu2 %vm236_vm1, %v662_v42 }
  0x55   : > { %3042 = vmatmul.msk.f32.vlgmr.msrb.gmra.mxu3 %vm236_vm1, %v3009_v43 }
  0x56   : > { %3107 = vmatmul.msk.f32.vlgmr.msrb.gmra.mxu0 %vm236_vm1, %v205_v16 }
  0x5b   : > { %2945 = vmatmul.msk.f32.gmra.mxu1 %vm236_vm1, %v171_v44  ;;  %v3883_v44 = vld [vmem:[%s3527_s28 + $0xa8] sm:$0xff] }
  0x5c   : > { %2978 = vmatmul.msk.f32.gmra.mxu2 %vm236_vm1, %v663_v45  ;;  %4705 = vst [vmem:[#allocation18_spill] sm:$0xff] %v3883_v44 }
  0x5d   : > { %3043 = vmatmul.msk.f32.gmra.mxu3 %vm236_vm1, %v3010_v46 }
  0x5e   : > { %3108 = vmatmul.msk.f32.gmra.mxu0 %vm236_vm1, %v206_v20 }
  0x63   : > { %2946 = vmatmul.msk.f32.gmra.mxu1 %vm236_vm1, %v3009_v43  ;;  %v3880_v43 = vld [vmem:[%s3527_s28 + $0x92] sm:$0xff] }
  0x64   : > { %2979 = vmatmul.msk.f32.gmra.mxu2 %vm236_vm1, %v3708_v47  ;;  %4704 = vst [vmem:[#allocation17_spill] sm:$0xff] %v3880_v43 }
  0x65   : > { %3044 = vmatmul.msk.f32.gmra.mxu3 %vm236_vm1, %v3711_v48 }
  0x66   : > { %3109 = vmatmul.msk.f32.gmra.mxu0 %vm236_vm1, %v3607_v24 }
  0x6b   : > { %2947 = vmatmul.msk.f32.gmra.mxu1 %vm236_vm1, %v3010_v46 }
  0x6c   : > { %2980 = vmatmul.msk.f32.gmra.mxu2 %vm236_vm1, %v3721_v49 }
  0x6d   : > { %3045 = vmatmul.msk.f32.gmra.mxu3 %vm236_vm1, %v3724_v50 }
  0x6e   : > { %3110 = vmatmul.msk.f32.gmra.mxu0 %vm236_vm1, %v3639_v31 }
  0x73   : > { %2948 = vmatmul.msk.f32.gmra.mxu1 %vm236_vm1, %v3711_v48 }
  0x74   : > { %2981 = vmatmul.msk.f32.gmra.mxu2 %vm236_vm1, %v3734_v51 }
  0x75   : > { %3046 = vmatmul.msk.f32.gmra.mxu3 %vm236_vm1, %v3737_v52 }
  0x76   : > { %3111 = vmatmul.msk.f32.gmra.mxu0 %vm236_vm1, %v3663_v36 }
  0x7b   : > { %2949 = vmatmul.msk.f32.gmra.mxu1 %vm236_vm1, %v3724_v50 }
  0x7c   : > { %2982 = vmatmul.msk.f32.gmra.mxu2 %vm236_vm1, %v3748_v53 }
  0x7d   : > { %3047 = vmatmul.msk.f32.gmra.mxu3 %vm236_vm1, %v3751_v54 }
  0x7e   : > { %3112 = vmatmul.msk.f32.gmra.mxu0 %vm236_vm1, %v3683_v40 }
  0x83   : > { %2950 = vmatmul.msk.f32.gmra.mxu1 %vm236_vm1, %v3737_v52 }
  0x84   : > { %2983 = vmatmul.msk.f32.gmra.mxu2 %vm236_vm1, %v3762_v55 }
  0x85   : > { %3048 = vmatmul.msk.f32.gmra.mxu3 %vm236_vm1, %v3765_v56 }
  0x86   : > { %3113 = vmatmul.msk.f32.gmra.mxu0 %vm236_vm1, %v3530_v5 }
  0x8b   : > { %2951 = vmatmul.msk.f32.gmra.mxu1 %vm236_vm1, %v3751_v54 }
  0x8c   : > { %2984 = vmatmul.msk.f32.gmra.mxu2 %vm236_vm1, %v3776_v57 }
  0x8d   : > { %3049 = vmatmul.msk.f32.gmra.mxu3 %vm236_vm1, %v3779_v58 }
  0x8e   : > { %3114 = vmatmul.msk.f32.gmra.mxu0 %vm236_vm1, %v3547_v9 }
  0x90   : > { %v3789_v59 = vpop.f32.mrf.mxu1 }
  0x93   : > { %v3797_v62 = vpop.f32.mrf.mxu0  ;;  %2952 = vmatmul.msk.f32.gmra.mxu1 %vm236_vm1, %v3765_v56 }
  0x94   : > { %2985 = vmatmul.msk.f32.gmra.mxu2 %vm236_vm1, %v3792_v60 }
  0x95   : > { %3050 = vmatmul.msk.f32.gmra.mxu3 %vm236_vm1, %v3795_v61 }
  0x96   : > { %3115 = vmatmul.msk.f32.gmra.mxu0 %vm236_vm1, %v3564_v13  ;;  %v3839_v13 = vld [vmem:[%s3527_s28 + $0x90] sm:$0xff] }
  0x97   : > { %v3807_v63 = vpop.f32.mrf.mxu2  ;;  %4699 = vst [vmem:[#allocation12_spill] sm:$0xff] %v3839_v13 }
  0x98   : > { %v3809_v0 = vpop.f32.mrf.mxu3  ;;  %v3811_v1 = vpop.f32.mrf.mxu1 }
  0x99   : > { %4694 = vst [vmem:[#allocation7_spill] sm:$0xff] %v3809_v0 }
  0x9b   : > { %v3819_v4 = vpop.f32.mrf.mxu0  ;;  %2953 = vmatmul.msk.f32.gmra.mxu1 %vm236_vm1, %v3779_v58  ;;  %v3984_v58 = vld [vmem:[%s3527_s28 + $0xe0] sm:$0xff] }
  0x9c   : > { %2986 = vmatmul.msk.f32.gmra.mxu2 %vm236_vm1, %v3814_v2  ;;  %v3981_v2 = vld [vmem:[%s3527_s28 + $0xca] sm:$0xff] }
  0x9d   : > { %3051 = vmatmul.msk.f32.gmra.mxu3 %vm236_vm1, %v3817_v3 }
  0x9e   : > { %3116 = vmatmul.msk.f32.gmra.mxu0 %vm236_vm1, %v3581_v17 }
  0x9f   : > { %v3829_v5 = vpop.f32.mrf.mxu2 }
  0xa0   : > { %v3831_v8 = vpop.f32.mrf.mxu3  ;;  %v3833_v9 = vpop.f32.mrf.mxu1 }
  0xa1   : > { %4697 = vst [vmem:[#allocation10_spill] sm:$0xff] %v3831_v8  ;;  %v3905_v8 = vld [vmem:[%s3527_s28 + $0xb0] sm:$0xff] }
  0xa2   : > { %4709 = vst [vmem:[#allocation22_spill] sm:$0xff] %v3905_v8 }
  0xa3   : > { %v3841_v16 = vpop.f32.mrf.mxu0  ;;  %2954 = vmatmul.msk.f32.gmra.mxu1 %vm236_vm1, %v3795_v61  ;;  %v3969_v61 = vld [vmem:[%s3527_s28 + $0xd8] sm:$0xff] }
  0xa4   : > { %2987 = vmatmul.msk.f32.gmra.mxu2 %vm236_vm1, %v3836_v12 }
  0xa5   : > { %3052 = vmatmul.msk.f32.gmra.mxu3 %vm236_vm1, %v3839_v13 }
  0xa6   : > { %3117 = vmatmul.msk.f32.gmra.mxu0 %vm236_vm1, %v3598_v21 }
  0xa7   : > { %v3851_v17 = vpop.f32.mrf.mxu2 }
  0xa8   : > { %v3853_v20 = vpop.f32.mrf.mxu3  ;;  %v3855_v25 = vpop.f32.mrf.mxu1 }
  0xa9   : > { %4700 = vst [vmem:[#allocation13_spill] sm:$0xff] %v3853_v20  ;;  %v3902_v20 = vld [vmem:[%s3527_s28 + $0x9a] sm:$0xff] }
  0xaa   : > { %4708 = vst [vmem:[#allocation21_spill] sm:$0xff] %v3902_v20 }
  0xab   : > { %v3863_v32 = vpop.f32.mrf.mxu0  ;;  %2955 = vmatmul.msk.f32.gmra.mxu1 %vm236_vm1, %v3817_v3  ;;  %v3946_v3 = vld [vmem:[%s3527_s28 + $0xb2] sm:$0xff] }
  0xac   : > { %2988 = vmatmul.msk.f32.gmra.mxu2 %vm236_vm1, %v3858_v26  ;;  %4716 = vst [vmem:[#allocation29_spill] sm:$0xff] %v3946_v3 }
  0xad   : > { %3053 = vmatmul.msk.f32.gmra.mxu3 %vm236_vm1, %v3861_v27 }
  0xae   : > { %3118 = vmatmul.msk.f32.gmra.mxu0 %vm236_vm1, %v3630_v28 }
  0xaf   : > { %v3873_v21 = vpop.f32.mrf.mxu2 }
  0xb0   : > { %v3875_v41 = vpop.f32.mrf.mxu3  ;;  %v3877_v42 = vpop.f32.mrf.mxu1 }
  0xb1   : > { %4703 = vst [vmem:[#allocation16_spill] sm:$0xff] %v3875_v41 }
  0xb3   : > { %v3885_v45 = vpop.f32.mrf.mxu0  ;;  %2956 = vmatmul.msk.f32.gmra.mxu1 %vm236_vm1, %v3839_v13  ;;  %v3924_v13 = vld [vmem:[%s3527_s28 + $0xaa] sm:$0xff] }
  0xb4   : > { %2989 = vmatmul.msk.f32.gmra.mxu2 %vm236_vm1, %v3880_v43  ;;  %4712 = vst [vmem:[#allocation25_spill] sm:$0xff] %v3924_v13 }
  0xb5   : > { %3054 = vmatmul.msk.f32.gmra.mxu3 %vm236_vm1, %v3883_v44 }
  0xb6   : > { %3119 = vmatmul.msk.f32.gmra.mxu0 %vm236_vm1, %v3654_v33 }
  0xb7   : > { %v3895_v28 = vpop.f32.mrf.mxu2 }
  0xb8   : > { %4706 = vst [vmem:[#allocation19_spill] sm:$0xff] %v3895_v28  ;;  %v3897_v46 = vpop.f32.mrf.mxu3  ;;  %v3899_v41 = vpop.f32.mrf.mxu1 }
  0xb9   : > { %4707 = vst [vmem:[#allocation20_spill] sm:$0xff] %v3897_v46 }
  0xbb   : > { %v3907_v0 = vpop.f32.mrf.mxu0  ;;  %2957 = vmatmul.msk.f32.gmra.mxu1 %vm236_vm1, %v3861_v27  ;;  %v3927_v27 = vld [vmem:[%s3527_s28 + $0xc0] sm:$0xff] }
  0xbc   : > { %2990 = vmatmul.msk.f32.gmra.mxu2 %vm236_vm1, %v3902_v20  ;;  %4713 = vst [vmem:[#allocation26_spill] sm:$0xff] %v3927_v27 }
  0xbd   : > { %3055 = vmatmul.msk.f32.gmra.mxu3 %vm236_vm1, %v3905_v8 }
  0xbe   : > { %3120 = vmatmul.msk.f32.gmra.mxu0 %vm236_vm1, %v3674_v37 }
  0xbf   : > { %v3917_v33 = vpop.f32.mrf.mxu2 }
  0xc0   : > { %4710 = vst [vmem:[#allocation23_spill] sm:$0xff] %v3917_v33  ;;  %v3919_v46 = vpop.f32.mrf.mxu3  ;;  %v3921_v43 = vpop.f32.mrf.mxu1 }
  0xc1   : > { %4711 = vst [vmem:[#allocation24_spill] sm:$0xff] %v3919_v46 }
  0xc3   : > { %v3929_v26 = vpop.f32.mrf.mxu0  ;;  %2958 = vmatmul.msk.f32.gmra.mxu1 %vm236_vm1, %v3883_v44  ;;  %v3949_v44 = vld [vmem:[%s3527_s28 + $0xc8] sm:$0xff] }
  0xc4   : > { %2991 = vmatmul.msk.f32.gmra.mxu2 %vm236_vm1, %v3924_v13 }
  0xc5   : > { %3056 = vmatmul.msk.f32.gmra.mxu3 %vm236_vm1, %v3927_v27 }
  0xc6   : > { %3121 = vmatmul.msk.f32.gmra.mxu0 %vm236_vm1, %v3533_v6 }
  0xc7   : > { %v3939_v37 = vpop.f32.mrf.mxu2 }
  0xc8   : > { %4714 = vst [vmem:[#allocation27_spill] sm:$0xff] %v3939_v37  ;;  %v3941_v46 = vpop.f32.mrf.mxu3  ;;  %v3943_v20 = vpop.f32.mrf.mxu1  ;;  %v3966_v37 = vld [vmem:[%s3527_s28 + $0xc2] sm:$0xff] }
  0xc9   : > { %4715 = vst [vmem:[#allocation28_spill] sm:$0xff] %v3941_v46 }
  0xca   : > { %4719 = vst [vmem:[#allocation32_spill] sm:$0xff] %v3966_v37 }
  0xcb   : > { %v3951_v12 = vpop.f32.mrf.mxu0  ;;  %2959 = vmatmul.msk.f32.gmra.mxu1 %vm236_vm1, %v3905_v8 }
  0xcc   : > { %2992 = vmatmul.msk.f32.gmra.mxu2 %vm236_vm1, %v3946_v3 }
  0xcd   : > { %3057 = vmatmul.msk.f32.gmra.mxu3 %vm236_vm1, %v3949_v44 }
  0xce   : > { %3122 = vmatmul.msk.f32.gmra.mxu0 %vm236_vm1, %v3550_v10 }
  0xcf   : > { %v3961_v6 = vpop.f32.mrf.mxu2 }
  0xd0   : > { %4717 = vst [vmem:[#allocation30_spill] sm:$0xff] %v3961_v6  ;;  %v3963_v46 = vpop.f32.mrf.mxu3  ;;  %v566_v13 = vpop.f32.mrf.mxu1 }
  0xd1   : > { %4718 = vst [vmem:[#allocation31_spill] sm:$0xff] %v3963_v46  ;;  %v567_v10 = vadd.f32 %v566_v13, %v3797_v62 }
  0xd3   : > { %v1366_v8 = vpop.f32.mrf.mxu0  ;;  %2960 = vmatmul.msk.f32.gmra.mxu1 %vm236_vm1, %v3927_v27 }
  0xd4   : > { %2993 = vmatmul.msk.f32.gmra.mxu2 %vm236_vm1, %v3966_v37 }
  0xd5   : > { %3058 = vmatmul.msk.f32.gmra.mxu3 %vm236_vm1, %v3969_v61 }
  0xd6   : > { %3123 = vmatmul.msk.f32.gmra.mxu0 %vm236_vm1, %v3567_v14 }
  0xd7   : > { %v811_v46 = vpop.f32.mrf.mxu2 }
  0xd8   : > { %v907_v3 = vadd.f32 %v811_v46, %v567_v10  ;;  %v1089_v6 = vpop.f32.mrf.mxu3  ;;  %v569_v33 = vpop.f32.mrf.mxu1 }
  0xd9   : > { %v570_v14 = vadd.f32 %v569_v33, %v3819_v4 }
  0xda   : > { %v1185_v27 = vadd.f32 %v1089_v6, %v907_v3  ;;  %v4001_v6 = vld [vmem:[%s3527_s28 + $0xf0] sm:$0xff] }
  0xdb   : > { %v1369_v37 = vpop.f32.mrf.mxu0  ;;  %2961 = vmatmul.msk.f32.gmra.mxu1 %vm236_vm1, %v3949_v44 }
  0xdc   : > { %v3986_v28 = vadd.f32 %v1366_v8, %v1185_v27  ;;  %2994 = vmatmul.msk.f32.gmra.mxu2 %vm236_vm1, %v3981_v2  ;;  %v3998_v27 = vld [vmem:[%s3527_s28 + $0xda] sm:$0xff] }
  0xdd   : > { %3059 = vmatmul.msk.f32.gmra.mxu3 %vm236_vm1, %v3984_v58 }
  0xde   : > { %4720 = vst [vmem:[#allocation33_spill] sm:$0xff] %v3986_v28  ;;  %3124 = vmatmul.msk.f32.gmra.mxu0 %vm236_vm1, %v3584_v18 }
  0xdf   : > { %v814_v62 = vpop.f32.mrf.mxu2 }
  0xe0   : > { %v908_v3 = vadd.f32 %v814_v62, %v570_v14  ;;  %v1092_v13 = vpop.f32.mrf.mxu3  ;;  %v572_v8 = vpop.f32.mrf.mxu1  ;;  %v4015_v62 = vld [vmem:[%s3527_s28 + $0xe2] sm:$0xff] }
  0xe1   : > { %v573_v18 = vadd.f32 %v572_v8, %v3841_v16 }
  0xe2   : > { %v1186_v46 = vadd.f32 %v1092_v13, %v908_v3  ;;  %v4018_v13 = vld [vmem:[%s3527_s28 + $0xf8] sm:$0xff] }
  0xe3   : > { %v1372_v10 = vpop.f32.mrf.mxu0  ;;  %2962 = vmatmul.msk.f32.gmra.mxu1 %vm236_vm1, %v3969_v61 }
  0xe4   : > { %v4003_v28 = vadd.f32 %v1369_v37, %v1186_v46  ;;  %2995 = vmatmul.msk.f32.gmra.mxu2 %vm236_vm1, %v3998_v27 }
  0xe5   : > { %3060 = vmatmul.msk.f32.gmra.mxu3 %vm236_vm1, %v4001_v6 }
  0xe6   : > { %4721 = vst [vmem:[#allocation34_spill] sm:$0xff] %v4003_v28  ;;  %3125 = vmatmul.msk.f32.gmra.mxu0 %vm236_vm1, %v3601_v22 }
  0xe7   : > { %v817_v4 = vpop.f32.mrf.mxu2 }
  0xe8   : > { %v909_v33 = vadd.f32 %v817_v4, %v573_v18  ;;  %v1095_v14 = vpop.f32.mrf.mxu3  ;;  %v575_v37 = vpop.f32.mrf.mxu1  ;;  %v4032_v4 = vld [vmem:[%s3527_s28 + $0xf2] sm:$0xff] }
  0xe9   : > { %v576_v22 = vadd.f32 %v575_v37, %v3863_v32 }
  0xea   : > { %v1187_v3 = vadd.f32 %v1095_v14, %v909_v33  ;;  %v4035_v14 = vld [vmem:[%s3527_s28 + $0x108] sm:$0xff] }
  0xeb   : > { %v1375_v46 = vpop.f32.mrf.mxu0  ;;  %2963 = vmatmul.msk.f32.gmra.mxu1 %vm236_vm1, %v3984_v58 }
  0xec   : > { %v4020_v28 = vadd.f32 %v1372_v10, %v1187_v3  ;;  %2996 = vmatmul.msk.f32.gmra.mxu2 %vm236_vm1, %v4015_v62 }
  0xed   : > { %3061 = vmatmul.msk.f32.gmra.mxu3 %vm236_vm1, %v4018_v13 }
  0xee   : > { %4722 = vst [vmem:[#allocation35_spill] sm:$0xff] %v4020_v28  ;;  %3126 = vmatmul.msk.f32.gmra.mxu0 %vm236_vm1, %v3633_v29 }
  0xef   : > { %v820_v16 = vpop.f32.mrf.mxu2 }
  0xf0   : > { %v910_v8 = vadd.f32 %v820_v16, %v576_v22  ;;  %v1098_v18 = vpop.f32.mrf.mxu3  ;;  %v578_v10 = vpop.f32.mrf.mxu1  ;;  %v4049_v16 = vld [vmem:[%s3527_s28 + $0xfa] sm:$0xff] }
  0xf1   : > { %v579_v29 = vadd.f32 %v578_v10, %v3885_v45 }
  0xf2   : > { %v1188_v33 = vadd.f32 %v1098_v18, %v910_v8  ;;  %v4052_v18 = vld [vmem:[%s3527_s28 + $0x110] sm:$0xff] }
  0xf3   : > { %v1378_v3 = vpop.f32.mrf.mxu0  ;;  %2964 = vmatmul.msk.f32.gmra.mxu1 %vm236_vm1, %v4001_v6 }
  0xf4   : > { %v4037_v28 = vadd.f32 %v1375_v46, %v1188_v33  ;;  %2997 = vmatmul.msk.f32.gmra.mxu2 %vm236_vm1, %v4032_v4 }
  0xf5   : > { %3062 = vmatmul.msk.f32.gmra.mxu3 %vm236_vm1, %v4035_v14 }
  0xf6   : > { %4723 = vst [vmem:[#allocation36_spill] sm:$0xff] %v4037_v28  ;;  %3127 = vmatmul.msk.f32.gmra.mxu0 %vm236_vm1, %v3657_v34 }
  0xf7   : > { %v823_v32 = vpop.f32.mrf.mxu2 }
  0xf8   : > { %v911_v37 = vadd.f32 %v823_v32, %v579_v29  ;;  %v1101_v22 = vpop.f32.mrf.mxu3  ;;  %v581_v46 = vpop.f32.mrf.mxu1  ;;  %v4066_v32 = vld [vmem:[%s3527_s28 + $0x10a] sm:$0xff] }
  0xf9   : > { %v582_v34 = vadd.f32 %v581_v46, %v3907_v0 }
  0xfa   : > { %v1189_v8 = vadd.f32 %v1101_v22, %v911_v37  ;;  %v4069_v22 = vld [vmem:[%s3527_s28 + $0x120] sm:$0xff] }
  0xfb   : > { %v1381_v33 = vpop.f32.mrf.mxu0  ;;  %2965 = vmatmul.msk.f32.gmra.mxu1 %vm236_vm1, %v4018_v13 }
  0xfc   : > { %v4054_v28 = vadd.f32 %v1378_v3, %v1189_v8  ;;  %2998 = vmatmul.msk.f32.gmra.mxu2 %vm236_vm1, %v4049_v16 }
  0xfd   : > { %3063 = vmatmul.msk.f32.gmra.mxu3 %vm236_vm1, %v4052_v18 }
  0xfe   : > { %4724 = vst [vmem:[#allocation37_spill] sm:$0xff] %v4054_v28  ;;  %3128 = vmatmul.msk.f32.gmra.mxu0 %vm236_vm1, %v3677_v38 }
  0xff   : > { %v826_v45 = vpop.f32.mrf.mxu2 }
 0x100   : > { %v912_v10 = vadd.f32 %v826_v45, %v582_v34  ;;  %v1104_v29 = vpop.f32.mrf.mxu3  ;;  %v584_v3 = vpop.f32.mrf.mxu1  ;;  %v4083_v45 = vld [vmem:[%s3527_s28 + $0x112] sm:$0xff] }
 0x101   : > { %v585_v38 = vadd.f32 %v584_v3, %v3929_v26 }
 0x102   : > { %v1190_v37 = vadd.f32 %v1104_v29, %v912_v10  ;;  %v4086_v29 = vld [vmem:[%s3527_s28 + $0x128] sm:$0xff] }
 0x103   : > { %v1384_v8 = vpop.f32.mrf.mxu0  ;;  %2966 = vmatmul.msk.f32.gmra.mxu1 %vm236_vm1, %v4035_v14 }
 0x104   : > { %v4071_v28 = vadd.f32 %v1381_v33, %v1190_v37  ;;  %2999 = vmatmul.msk.f32.gmra.mxu2 %vm236_vm1, %v4066_v32 }
 0x105   : > { %3064 = vmatmul.msk.f32.gmra.mxu3 %vm236_vm1, %v4069_v22 }
 0x106   : > { %4725 = vst [vmem:[#allocation38_spill] sm:$0xff] %v4071_v28  ;;  %3129 = vmatmul.msk.f32.gmra.mxu0 %vm236_vm1, %v3536_v7 }
 0x107   : > { %v829_v0 = vpop.f32.mrf.mxu2 }
 0x108   : > { %v913_v46 = vadd.f32 %v829_v0, %v585_v38  ;;  %v1107_v34 = vpop.f32.mrf.mxu3  ;;  %v587_v33 = vpop.f32.mrf.mxu1  ;;  %v4100_v0 = vld [vmem:[%s3527_s28 + $0x122] sm:$0xff] }
 0x109   : > { %v588_v7 = vadd.f32 %v587_v33, %v3951_v12 }
 0x10a   : > { %v1191_v10 = vadd.f32 %v1107_v34, %v913_v46  ;;  %v3033_v34 = vld [vmem:[%s3527_s28 + $0x138] sm:$0xff] }
 0x10b   : > { %v1387_v37 = vpop.f32.mrf.mxu0  ;;  %2967 = vmatmul.msk.f32.gmra.mxu1 %vm236_vm1, %v4052_v18 }
 0x10c   : > { %v4088_v28 = vadd.f32 %v1384_v8, %v1191_v10  ;;  %3000 = vmatmul.msk.f32.gmra.mxu2 %vm236_vm1, %v4083_v45 }
 0x10d   : > { %3065 = vmatmul.msk.f32.gmra.mxu3 %vm236_vm1, %v4086_v29 }
 0x10e   : > { %4726 = vst [vmem:[#allocation39_spill] sm:$0xff] %v4088_v28  ;;  %3130 = vmatmul.msk.f32.gmra.mxu0 %vm236_vm1, %v3553_v11 }
 0x10f   : > { %v832_v26 = vpop.f32.mrf.mxu2 }
 0x110   : > { %v914_v3 = vadd.f32 %v832_v26, %v588_v7  ;;  %v1110_v38 = vpop.f32.mrf.mxu3  ;;  %v590_v8 = vpop.f32.mrf.mxu1 }
 0x111   : > { %v591_v11 = vadd.f32 %v590_v8, %v3789_v59 }
 0x112   : > { %v1192_v46 = vadd.f32 %v1110_v38, %v914_v3  ;;  %v3034_v38 = vld [vmem:[%s3527_s28 + $0x140] sm:$0xff] }
 0x113   : > { %v1390_v10 = vpop.f32.mrf.mxu0  ;;  %2968 = vmatmul.msk.f32.gmra.mxu1 %vm236_vm1, %v4069_v22 }
 0x114   : > { %v4103_v28 = vadd.f32 %v1387_v37, %v1192_v46  ;;  %3001 = vmatmul.msk.f32.gmra.mxu2 %vm236_vm1, %v4100_v0  ;;  %v4114_v37 = vld [vmem:[%s3527_s28 + $0x12a] sm:$0xff] }
 0x115   : > { %3066 = vmatmul.msk.f32.gmra.mxu3 %vm236_vm1, %v3033_v34 }
 0x116   : > { %4727 = vst [vmem:[#allocation40_spill] sm:$0xff] %v4103_v28  ;;  %3131 = vmatmul.msk.f32.gmra.mxu0 %vm236_vm1, %v3570_v15 }
 0x117   : > { %v835_v12 = vpop.f32.mrf.mxu2 }
 0x118   : > { %v915_v33 = vadd.f32 %v835_v12, %v591_v11  ;;  %v1113_v7 = vpop.f32.mrf.mxu3  ;;  %v593_v26 = vpop.f32.mrf.mxu1 }
 0x119   : > { %v594_v15 = vadd.f32 %v593_v26, %v3811_v1 }
 0x11a   : > { %v1193_v3 = vadd.f32 %v1113_v7, %v915_v33  ;;  %v3035_v7 = vld [vmem:[%s3527_s28 + $0x150] sm:$0xff] }
 0x11b   : > { %v1393_v46 = vpop.f32.mrf.mxu0  ;;  %2969 = vmatmul.msk.f32.gmra.mxu1 %vm236_vm1, %v4086_v29 }
 0x11c   : > { %v4117_v28 = vadd.f32 %v1390_v10, %v1193_v3  ;;  %3002 = vmatmul.msk.f32.gmra.mxu2 %vm236_vm1, %v4114_v37  ;;  %v4128_v10 = vld [vmem:[%s3527_s28 + $0x13a] sm:$0xff] }
 0x11d   : > { %3067 = vmatmul.msk.f32.gmra.mxu3 %vm236_vm1, %v3034_v38 }
 0x11e   : > { %4728 = vst [vmem:[#allocation41_spill] sm:$0xff] %v4117_v28  ;;  %3132 = vmatmul.msk.f32.gmra.mxu0 %vm236_vm1, %v3587_v19 }
 0x11f   : > { %v838_v59 = vpop.f32.mrf.mxu2 }
 0x120   : > { %v916_v8 = vadd.f32 %v838_v59, %v594_v15  ;;  %v1116_v11 = vpop.f32.mrf.mxu3  ;;  %v596_v12 = vpop.f32.mrf.mxu1 }
 0x121   : > { %v597_v19 = vadd.f32 %v596_v12, %v3833_v9 }
 0x122   : > { %v1194_v33 = vadd.f32 %v1116_v11, %v916_v8  ;;  %v689_v8 = vld [vmem:[%s3527_s28 + $0x142] sm:$0xff]  ;;  %v3036_v11 = vld [vmem:[%s3527_s28 + $0x158] sm:$0xff] }
 0x123   : > { %v1396_v3 = vpop.f32.mrf.mxu0  ;;  %2970 = vmatmul.msk.f32.gmra.mxu1 %vm236_vm1, %v3033_v34 }
 0x124   : > { %v4131_v28 = vadd.f32 %v1393_v46, %v1194_v33  ;;  %3003 = vmatmul.msk.f32.gmra.mxu2 %vm236_vm1, %v4128_v10 }
 0x125   : > { %3068 = vmatmul.msk.f32.gmra.mxu3 %vm236_vm1, %v3035_v7 }
 0x126   : > { %3133 = vmatmul.msk.f32.gmra.mxu0 %vm236_vm1, %v3604_v23 }
 0x127   : > { %v841_v1 = vpop.f32.mrf.mxu2 }
 0x128   : > { %v917_v26 = vadd.f32 %v841_v1, %v597_v19  ;;  %v1119_v15 = vpop.f32.mrf.mxu3  ;;  %v599_v59 = vpop.f32.mrf.mxu1 }
 0x129   : > { %v600_v23 = vadd.f32 %v599_v59, %v3855_v25 }
 0x12a   : > { %v1195_v46 = vadd.f32 %v1119_v15, %v917_v26  ;;  %v690_v26 = vld [vmem:[%s3527_s28 + $0x152] sm:$0xff]  ;;  %v3037_v15 = vld [vmem:[%s3527_s28 + $0x168] sm:$0xff] }
 0x12b   : > { %v1399_v34 = vpop.f32.mrf.mxu0  ;;  %2971 = vmatmul.msk.f32.gmra.mxu1 %vm236_vm1, %v3034_v38 }
 0x12c   : > { %v4142_v33 = vadd.f32 %v1396_v3, %v1195_v46  ;;  %3004 = vmatmul.msk.f32.gmra.mxu2 %vm236_vm1, %v689_v8 }
 0x12d   : > { %3069 = vmatmul.msk.f32.gmra.mxu3 %vm236_vm1, %v3036_v11 }
 0x12e   : > { %3134 = vmatmul.msk.f32.gmra.mxu0 %vm236_vm1, %v3636_v30 }
 0x12f   : > { %v844_v9 = vpop.f32.mrf.mxu2 }
 0x130   : > { %v918_v12 = vadd.f32 %v844_v9, %v600_v23  ;;  %v1122_v19 = vpop.f32.mrf.mxu3  ;;  %v602_v1 = vpop.f32.mrf.mxu1  ;;  %v691_v9 = vld [vmem:[%s3527_s28 + $0x15a] sm:$0xff] }
 0x131   : > { %v603_v30 = vadd.f32 %v602_v1, %v3877_v42 }
 0x132   : > { %v1196_v3 = vadd.f32 %v1122_v19, %v918_v12  ;;  %v3038_v12 = vld [vmem:[%s3527_s28 + $0x170] sm:$0xff] }
 0x133   : > { %v1402_v46 = vpop.f32.mrf.mxu0  ;;  %2972 = vmatmul.msk.f32.gmra.mxu1 %vm236_vm1, %v3035_v7 }
 0x134   : > { %v4152_v38 = vadd.f32 %v1399_v34, %v1196_v3  ;;  %3005 = vmatmul.msk.f32.gmra.mxu2 %vm236_vm1, %v690_v26 }
 0x135   : > { %3070 = vmatmul.msk.f32.gmra.mxu3 %vm236_vm1, %v3037_v15 }
 0x136   : > { %3135 = vmatmul.msk.f32.gmra.mxu0 %vm236_vm1, %v3660_v35 }
 0x137   : > { %v847_v25 = vpop.f32.mrf.mxu2 }
 0x138   : > { %v919_v59 = vadd.f32 %v847_v25, %v603_v30  ;;  %v1125_v8 = vpop.f32.mrf.mxu3  ;;  %v605_v23 = vpop.f32.mrf.mxu1  ;;  %v692_v30 = vld [vmem:[%s3527_s28 + $0x16a] sm:$0xff] }
 0x139   : > { %v606_v35 = vadd.f32 %v605_v23, %v3899_v41 }
 0x13a   : > { %v1197_v34 = vadd.f32 %v1125_v8, %v919_v59 }
 0x13b   : > { %v1405_v7 = vpop.f32.mrf.mxu0  ;;  %2973 = vmatmul.msk.f32.gmra.mxu1 %vm236_vm1, %v3036_v11  ;;  %v3104_v11 = vld [vmem:[%s3527_s28 + $0x181] sm:$0xff] }
 0x13c   : > { %v4162_v19 = vadd.f32 %v1402_v46, %v1197_v34  ;;  %3006 = vmatmul.msk.f32.gmra.mxu2 %vm236_vm1, %v691_v9  ;;  %v3039_v46 = vld [vmem:[%s3527_s28 + $0x180] sm:$0xff] }
 0x13d   : > { %3071 = vmatmul.msk.f32.gmra.mxu3 %vm236_vm1, %v3038_v12 }
 0x13e   : > { %3136 = vmatmul.msk.f32.gmra.mxu0 %vm236_vm1, %v3680_v39 }
 0x13f   : > { %v850_v42 = vpop.f32.mrf.mxu2 }
 0x140   : > { %v920_v1 = vadd.f32 %v850_v42, %v606_v35  ;;  %v1128_v26 = vpop.f32.mrf.mxu3  ;;  %v608_v3 = vpop.f32.mrf.mxu1  ;;  %v693_v35 = vld [vmem:[%s3527_s28 + $0x172] sm:$0xff] }
 0x141   : > { %v609_v39 = vadd.f32 %v608_v3, %v3921_v43 }
 0x142   : > { %v1198_v25 = vadd.f32 %v1128_v26, %v920_v1  ;;  %v3040_v1 = vld [vmem:[%s3527_s28 + $0x188] sm:$0xff] }
 0x143   : > { %v1408_v59 = vpop.f32.mrf.mxu0  ;;  %2974 = vmatmul.msk.f32.gmra.mxu1 %vm236_vm1, %v3037_v15 }
 0x144   : > { %v4173_v8 = vadd.f32 %v1405_v7, %v1198_v25  ;;  %3007 = vmatmul.msk.f32.gmra.mxu2 %vm236_vm1, %v692_v30  ;;  %v3105_v7 = vld [vmem:[%s3527_s28 + $0x189] sm:$0xff] }
 0x145   : > { %3072 = vmatmul.msk.f32.gmra.mxu3 %vm236_vm1, %v3039_v46 }
 0x146   : > { %3137 = vmatmul.msk.f32.gmra.mxu0 %vm236_vm1, %v3104_v11 }
 0x147   : > { %v853_v41 = vpop.f32.mrf.mxu2 }
 0x148   : > { %v921_v23 = vadd.f32 %v853_v41, %v609_v39  ;;  %v1131_v9 = vpop.f32.mrf.mxu3  ;;  %v611_v34 = vpop.f32.mrf.mxu1 }
 0x149   : > { %v612_v43 = vadd.f32 %v611_v34, %v3943_v20 }
 0x14a   : > { %v1199_v42 = vadd.f32 %v1131_v9, %v921_v23 }
 0x14b   : > { %v1411_v26 = vpop.f32.mrf.mxu0  ;;  %2975 = vmatmul.msk.f32.gmra.mxu1 %vm236_vm1, %v3038_v12 }
 0x14c   : > { %v4183_v25 = vadd.f32 %v1408_v59, %v1199_v42  ;;  %3008 = vmatmul.msk.f32.gmra.mxu2 %vm236_vm1, %v693_v35 }
 0x14d   : > { %3073 = vmatmul.msk.f32.gmra.mxu3 %vm236_vm1, %v3040_v1 }
 0x14e   : > { %3138 = vmatmul.msk.f32.gmra.mxu0 %vm236_vm1, %v3105_v7 }
 0x14f   : > { %v856_v15 = vpop.f32.mrf.mxu2 }
 0x150   : > { %v922_v3 = vadd.f32 %v856_v15, %v612_v43  ;;  %v1134_v30 = vpop.f32.mrf.mxu3  ;;  %v614_v46 = vpop.f32.mrf.mxu1 }
 0x151   : > { %v615_v20 = vadd.f32 %v614_v46, %v3807_v63 }
 0x152   : > { %v1200_v11 = vadd.f32 %v1134_v30, %v922_v3 }
 0x153   : > { %v1414_v39 = vpop.f32.mrf.mxu0  ;;  %3172 = vmatmul.msk.f32.vlgmr.msra.gmra.mxu1 %vm236_vm1, %v3708_v47 }
 0x154   : > { %v4190_v41 = vadd.f32 %v1411_v26, %v1200_v11  ;;  %3237 = vmatmul.msk.f32.vlgmr.msra.gmra.mxu2 %vm236_vm1, %v3711_v48 }
 0x155   : > { %3302 = vmatmul.msk.f32.vlgmr.msra.gmra.mxu3 %vm236_vm1, %v3607_v24 }
 0x156   : > { %3367 = vmatmul.msk.f32.vlgmr.msra.gmra.mxu0 %vm236_vm1, %v3734_v51 }
 0x157   : > { %v859_v12 = vpop.f32.mrf.mxu2 }
 0x158   : > { %v923_v59 = vadd.f32 %v859_v12, %v615_v20  ;;  %v1137_v23 = vpop.f32.mrf.mxu3  ;;  %v617_v9 = vpop.f32.mrf.mxu1  ;;  %v3273_v20 = vld [vmem:[%s3527_s28 + $0x61] sm:$0xff] }
 0x159   : > { %v618_v24 = vadd.f32 %v617_v9, %v3829_v5 }
 0x15a   : > { %v1201_v34 = vadd.f32 %v1137_v23, %v923_v59 }
 0x15b   : > { %v1417_v35 = vpop.f32.mrf.mxu0  ;;  %3173 = vmatmul.msk.f32.gmra.mxu1 %vm236_vm1, %v3721_v49 }
 0x15c   : > { %v4201_v42 = vadd.f32 %v1414_v39, %v1201_v34  ;;  %3238 = vmatmul.msk.f32.gmra.mxu2 %vm236_vm1, %v3724_v50 }
 0x15d   : > { %3303 = vmatmul.msk.f32.gmra.mxu3 %vm236_vm1, %v3639_v31 }
 0x15e   : > { %3368 = vmatmul.msk.f32.gmra.mxu0 %vm236_vm1, %v3748_v53 }
 0x15f   : > { %v862_v47 = vpop.f32.mrf.mxu2 }
 0x160   : > { %v924_v48 = vadd.f32 %v862_v47, %v618_v24  ;;  %v1140_v63 = vpop.f32.mrf.mxu3  ;;  %v620_v1 = vpop.f32.mrf.mxu1 }
 0x161   : > { %v621_v31 = vadd.f32 %v620_v1, %v3851_v17 }
 0x162   : > { %v1202_v26 = vadd.f32 %v1140_v63, %v924_v48  ;;  %v4732_v48 = vld [vmem:[#allocation23_spill] sm:$0xff] }
 0x163   : > { %v1420_v7 = vpop.f32.mrf.mxu0  ;;  %3174 = vmatmul.msk.f32.gmra.mxu1 %vm236_vm1, %v3734_v51 }
 0x164   : > { %v4212_v43 = vadd.f32 %v1417_v35, %v1202_v26  ;;  %3239 = vmatmul.msk.f32.gmra.mxu2 %vm236_vm1, %v3737_v52  ;;  %v3274_v35 = vld [vmem:[%s3527_s28 + $0x69] sm:$0xff] }
 0x165   : > { %3304 = vmatmul.msk.f32.gmra.mxu3 %vm236_vm1, %v3663_v36 }
 0x166   : > { %3369 = vmatmul.msk.f32.gmra.mxu0 %vm236_vm1, %v3762_v55 }
 0x167   : > { %v865_v49 = vpop.f32.mrf.mxu2 }
 0x168   : > { %v925_v50 = vadd.f32 %v865_v49, %v621_v31  ;;  %v1143_v5 = vpop.f32.mrf.mxu3  ;;  %v623_v15 = vpop.f32.mrf.mxu1 }
 0x169   : > { %v624_v36 = vadd.f32 %v623_v15, %v3873_v21 }
 0x16a   : > { %v1203_v3 = vadd.f32 %v1143_v5, %v925_v50  ;;  %v3275_v50 = vld [vmem:[%s3527_s28 + $0x79] sm:$0xff] }
 0x16b   : > { %v1423_v30 = vpop.f32.mrf.mxu0  ;;  %3175 = vmatmul.msk.f32.gmra.mxu1 %vm236_vm1, %v3748_v53 }
 0x16c   : > { %v4223_v46 = vadd.f32 %v1420_v7, %v1203_v3  ;;  %3240 = vmatmul.msk.f32.gmra.mxu2 %vm236_vm1, %v3751_v54  ;;  %v4734_v3 = vld [vmem:[#allocation11_spill] sm:$0xff] }
 0x16d   : > { %3305 = vmatmul.msk.f32.gmra.mxu3 %vm236_vm1, %v3683_v40  ;;  %v4729_v40 = vld [vmem:[#allocation19_spill] sm:$0xff] }
 0x16e   : > { %3370 = vmatmul.msk.f32.gmra.mxu0 %vm236_vm1, %v3776_v57 }
 0x16f   : > { %v868_v51 = vpop.f32.mrf.mxu2 }
 0x170   : > { %v926_v52 = vadd.f32 %v868_v51, %v624_v36  ;;  %v1146_v17 = vpop.f32.mrf.mxu3  ;;  %v626_v11 = vpop.f32.mrf.mxu1 }
 0x171   : > { %v627_v54 = vadd.f32 %v626_v11, %v4729_v40 }
 0x172   : > { %v1204_v39 = vadd.f32 %v1146_v17, %v926_v52 }
 0x173   : > { %v1426_v12 = vpop.f32.mrf.mxu0  ;;  %3176 = vmatmul.msk.f32.gmra.mxu1 %vm236_vm1, %v3762_v55  ;;  %v4730_v55 = vld [vmem:[#allocation5_spill] sm:$0xff] }
 0x174   : > { %v4235_v53 = vadd.f32 %v1423_v30, %v1204_v39  ;;  %3241 = vmatmul.msk.f32.gmra.mxu2 %vm236_vm1, %v3765_v56  ;;  %v4731_v56 = vld [vmem:[#allocation8_spill] sm:$0xff]  ;;  %v4735_v30 = vld [vmem:[#allocation27_spill] sm:$0xff] }
 0x175   : > { %3306 = vmatmul.msk.f32.gmra.mxu3 %vm236_vm1, %v3273_v20  ;;  %v3276_v20 = vld [vmem:[%s3527_s28 + $0x81] sm:$0xff] }
 0x176   : > { %3371 = vmatmul.msk.f32.gmra.mxu0 %vm236_vm1, %v3792_v60 }
 0x177   : > { %v871_v21 = vpop.f32.mrf.mxu2 }
 0x178   : > { %v927_v59 = vadd.f32 %v871_v21, %v627_v54  ;;  %v1149_v23 = vpop.f32.mrf.mxu3  ;;  %v629_v9 = vpop.f32.mrf.mxu1  ;;  %v4737_v54 = vld [vmem:[#allocation14_spill] sm:$0xff] }
 0x179   : > { %v630_v63 = vadd.f32 %v629_v9, %v4732_v48  ;;  %v4738_v21 = vld [vmem:[#allocation30_spill] sm:$0xff] }
 0x17a   : > { %v1205_v34 = vadd.f32 %v1149_v23, %v927_v59 }
 0x17b   : > { %v1429_v24 = vpop.f32.mrf.mxu0  ;;  %3177 = vmatmul.msk.f32.gmra.mxu1 %vm236_vm1, %v3776_v57  ;;  %v4733_v57 = vld [vmem:[#allocation6_spill] sm:$0xff] }
 0x17c   : > { %v4246_v47 = vadd.f32 %v1426_v12, %v1205_v34  ;;  %3242 = vmatmul.msk.f32.gmra.mxu2 %vm236_vm1, %v4730_v55  ;;  %v3277_v55 = vld [vmem:[%s3527_s28 + $0x91] sm:$0xff] }
 0x17d   : > { %3307 = vmatmul.msk.f32.gmra.mxu3 %vm236_vm1, %v3274_v35 }
 0x17e   : > { %3372 = vmatmul.msk.f32.gmra.mxu0 %vm236_vm1, %v4731_v56 }
 0x17f   : > { %v874_v1 = vpop.f32.mrf.mxu2 }
 0x180   : > { %v928_v26 = vadd.f32 %v874_v1, %v630_v63  ;;  %v1152_v7 = vpop.f32.mrf.mxu3  ;;  %v632_v31 = vpop.f32.mrf.mxu1  ;;  %v4740_v1 = vld [vmem:[#allocation17_spill] sm:$0xff] }
 0x181   : > { %v633_v36 = vadd.f32 %v632_v31, %v4735_v30  ;;  %v3278_v30 = vld [vmem:[%s3527_s28 + $0x99] sm:$0xff] }
 0x182   : > { %v1206_v49 = vadd.f32 %v1152_v7, %v928_v26  ;;  %v4741_v26 = vld [vmem:[#allocation7_spill] sm:$0xff] }
 0x183   : > { %v1432_v5 = vpop.f32.mrf.mxu0  ;;  %3178 = vmatmul.msk.f32.gmra.mxu1 %vm236_vm1, %v3792_v60  ;;  %v4736_v60 = vld [vmem:[#allocation9_spill] sm:$0xff] }
 0x184   : > { %v4257_v15 = vadd.f32 %v1429_v24, %v1206_v49  ;;  %3243 = vmatmul.msk.f32.gmra.mxu2 %vm236_vm1, %v4733_v57 }
 0x185   : > { %3308 = vmatmul.msk.f32.gmra.mxu3 %vm236_vm1, %v3275_v50 }
 0x186   : > { %3373 = vmatmul.msk.f32.gmra.mxu0 %vm236_vm1, %v4734_v3 }
 0x187   : > { %v877_v51 = vpop.f32.mrf.mxu2 }
 0x188   : > { %v929_v52 = vadd.f32 %v877_v51, %v633_v36  ;;  %v1155_v17 = vpop.f32.mrf.mxu3  ;;  %v635_v11 = vpop.f32.mrf.mxu1 }
 0x189   : > { %v636_v59 = vadd.f32 %v635_v11, %v4738_v21 }
 0x18a   : > { %v1207_v39 = vadd.f32 %v1155_v17, %v929_v52  ;;  %v4743_v52 = vld [vmem:[#allocation21_spill] sm:$0xff]  ;;  %v4744_v17 = vld [vmem:[#allocation10_spill] sm:$0xff] }
 0x18b   : > { %v1435_v12 = vpop.f32.mrf.mxu0  ;;  %3179 = vmatmul.msk.f32.gmra.mxu1 %vm236_vm1, %v4731_v56  ;;  %v4739_v56 = vld [vmem:[#allocation12_spill] sm:$0xff] }
 0x18c   : > { %v4268_v40 = vadd.f32 %v1432_v5, %v1207_v39  ;;  %3244 = vmatmul.msk.f32.gmra.mxu2 %vm236_vm1, %v4736_v60 }
 0x18d   : > { %3309 = vmatmul.msk.f32.gmra.mxu3 %vm236_vm1, %v3276_v20 }
 0x18e   : > { %3374 = vmatmul.msk.f32.gmra.mxu0 %vm236_vm1, %v4737_v54 }
 0x18f   : > { %v880_v23 = vpop.f32.mrf.mxu2 }
 0x190   : > { %v930_v9 = vadd.f32 %v880_v23, %v636_v59  ;;  %v1158_v34 = vpop.f32.mrf.mxu3  ;;  %v638_v35 = vpop.f32.mrf.mxu1  ;;  %v3279_v59 = vld [vmem:[%s3527_s28 + $0xa9] sm:$0xff] }
 0x191   : > { %v639_v7 = vadd.f32 %v638_v35, %v4741_v26  ;;  %v4747_v35 = vld [vmem:[#allocation13_spill] sm:$0xff] }
 0x192   : > { %v1208_v24 = vadd.f32 %v1158_v34, %v930_v9  ;;  %v4746_v34 = vld [vmem:[#allocation25_spill] sm:$0xff] }
 0x193   : > { %v1438_v48 = vpop.f32.mrf.mxu0  ;;  %3180 = vmatmul.msk.f32.gmra.mxu1 %vm236_vm1, %v4734_v3  ;;  %v4742_v3 = vld [vmem:[#allocation15_spill] sm:$0xff] }
 0x194   : > { %v4279_v63 = vadd.f32 %v1435_v12, %v1208_v24  ;;  %3245 = vmatmul.msk.f32.gmra.mxu2 %vm236_vm1, %v4739_v56 }
 0x195   : > { %3310 = vmatmul.msk.f32.gmra.mxu3 %vm236_vm1, %v3277_v55 }
 0x196   : > { %3375 = vmatmul.msk.f32.gmra.mxu0 %vm236_vm1, %v4740_v1 }
 0x197   : > { %v883_v31 = vpop.f32.mrf.mxu2 }
 0x198   : > { %v931_v49 = vadd.f32 %v883_v31, %v639_v7  ;;  %v1161_v50 = vpop.f32.mrf.mxu3  ;;  %v641_v5 = vpop.f32.mrf.mxu1  ;;  %v3280_v31 = vld [vmem:[%s3527_s28 + $0xb1] sm:$0xff] }
 0x199   : > { %v642_v11 = vadd.f32 %v641_v5, %v4744_v17  ;;  %v4749_v5 = vld [vmem:[#allocation29_spill] sm:$0xff] }
 0x19a   : > { %v1209_v57 = vadd.f32 %v1161_v50, %v931_v49 }
 0x19b   : > { %v1441_v36 = vpop.f32.mrf.mxu0  ;;  %3181 = vmatmul.msk.f32.gmra.mxu1 %vm236_vm1, %v4737_v54  ;;  %v4745_v54 = vld [vmem:[#allocation18_spill] sm:$0xff] }
 0x19c   : > { %v4290_v51 = vadd.f32 %v1438_v48, %v1209_v57  ;;  %3246 = vmatmul.msk.f32.gmra.mxu2 %vm236_vm1, %v4742_v3  ;;  %v4750_v57 = vld [vmem:[#allocation16_spill] sm:$0xff] }
 0x19d   : > { %3311 = vmatmul.msk.f32.gmra.mxu3 %vm236_vm1, %v3278_v30 }
 0x19e   : > { %3376 = vmatmul.msk.f32.gmra.mxu0 %vm236_vm1, %v4743_v52 }
 0x19f   : > { %v886_v39 = vpop.f32.mrf.mxu2 }
 0x1a0   : > { %v932_v20 = vadd.f32 %v886_v39, %v642_v11  ;;  %v1164_v12 = vpop.f32.mrf.mxu3  ;;  %v644_v60 = vpop.f32.mrf.mxu1 }
 0x1a1   : > { %v645_v24 = vadd.f32 %v644_v60, %v4747_v35 }
 0x1a2   : > { %v1210_v21 = vadd.f32 %v1164_v12, %v932_v20  ;;  %v3281_v20 = vld [vmem:[%s3527_s28 + $0xc1] sm:$0xff] }
 0x1a3   : > { %v1444_v23 = vpop.f32.mrf.mxu0  ;;  %3182 = vmatmul.msk.f32.gmra.mxu1 %vm236_vm1, %v4740_v1  ;;  %v4748_v1 = vld [vmem:[#allocation22_spill] sm:$0xff] }
 0x1a4   : > { %v4301_v9 = vadd.f32 %v1441_v36, %v1210_v21  ;;  %3247 = vmatmul.msk.f32.gmra.mxu2 %vm236_vm1, %v4745_v54  ;;  %v4752_v21 = vld [vmem:[#allocation32_spill] sm:$0xff] }
 0x1a5   : > { %3312 = vmatmul.msk.f32.gmra.mxu3 %vm236_vm1, %v3279_v59  ;;  %v4753_v59 = vld [vmem:[#allocation20_spill] sm:$0xff] }
 0x1a6   : > { %3377 = vmatmul.msk.f32.gmra.mxu0 %vm236_vm1, %v4746_v34 }
 0x1a7   : > { %v889_v55 = vpop.f32.mrf.mxu2 }
 0x1a8   : > { %v933_v48 = vadd.f32 %v889_v55, %v645_v24  ;;  %v1167_v56 = vpop.f32.mrf.mxu3  ;;  %v647_v26 = vpop.f32.mrf.mxu1 }
 0x1a9   : > { %v648_v30 = vadd.f32 %v647_v26, %v4750_v57 }
 0x1aa   : > { %v1211_v7 = vadd.f32 %v1167_v56, %v933_v48  ;;  %v3282_v56 = vld [vmem:[%s3527_s28 + $0xc9] sm:$0xff] }
 0x1ab   : > { %v1447_v49 = vpop.f32.mrf.mxu0  ;;  %3183 = vmatmul.msk.f32.gmra.mxu1 %vm236_vm1, %v4743_v52  ;;  %v4751_v52 = vld [vmem:[#allocation26_spill] sm:$0xff] }
 0x1ac   : > { %v4312_v50 = vadd.f32 %v1444_v23, %v1211_v7  ;;  %3248 = vmatmul.msk.f32.gmra.mxu2 %vm236_vm1, %v4748_v1 }
 0x1ad   : > { %3313 = vmatmul.msk.f32.gmra.mxu3 %vm236_vm1, %v3280_v31 }
 0x1ae   : > { %3378 = vmatmul.msk.f32.gmra.mxu0 %vm236_vm1, %v4749_v5 }
 0x1af   : > { %v892_v36 = vpop.f32.mrf.mxu2 }
 0x1b0   : > { %v934_v3 = vadd.f32 %v892_v36, %v648_v30  ;;  %v1170_v17 = vpop.f32.mrf.mxu3  ;;  %v650_v11 = vpop.f32.mrf.mxu1 }
 0x1b1   : > { %v651_v23 = vadd.f32 %v650_v11, %v4753_v59 }
 0x1b2   : > { %v1212_v39 = vadd.f32 %v1170_v17, %v934_v3  ;;  %v3283_v3 = vld [vmem:[%s3527_s28 + $0xd9] sm:$0xff] }
 0x1b3   : > { %v1450_v12 = vpop.f32.mrf.mxu0  ;;  %3184 = vmatmul.msk.f32.gmra.mxu1 %vm236_vm1, %v4746_v34  ;;  %v4754_v34 = vld [vmem:[#allocation24_spill] sm:$0xff] }
 0x1b4   : > { %v4323_v60 = vadd.f32 %v1447_v49, %v1212_v39  ;;  %3249 = vmatmul.msk.f32.gmra.mxu2 %vm236_vm1, %v4751_v52 }
 0x1b5   : > { %3314 = vmatmul.msk.f32.gmra.mxu3 %vm236_vm1, %v3281_v20 }
 0x1b6   : > { %3379 = vmatmul.msk.f32.gmra.mxu0 %vm236_vm1, %v4752_v21 }
 0x1b7   : > { %v895_v54 = vpop.f32.mrf.mxu2 }
 0x1b8   : > { %v935_v35 = vadd.f32 %v895_v54, %v651_v23  ;;  %v1173_v24 = vpop.f32.mrf.mxu3  ;;  %v653_v55 = vpop.f32.mrf.mxu1  ;;  %v3284_v23 = vld [vmem:[%s3527_s28 + $0xe1] sm:$0xff] }
 0x1b9   : > { %v654_v31 = vadd.f32 %v653_v55, %v4754_v34  ;;  %v3285_v34 = vld [vmem:[%s3527_s28 + $0xf1] sm:$0xff] }
 0x1ba   : > { %v1213_v48 = vadd.f32 %v1173_v24, %v935_v35 }
 0x1bb   : > { %v1453_v26 = vpop.f32.mrf.mxu0  ;;  %3185 = vmatmul.msk.f32.gmra.mxu1 %vm236_vm1, %v4749_v5 }
 0x1bc   : > { %v4334_v7 = vadd.f32 %v1450_v12, %v1213_v48  ;;  %3250 = vmatmul.msk.f32.gmra.mxu2 %vm236_vm1, %v3949_v44  ;;  %v4755_v44 = vld [vmem:[#allocation28_spill] sm:$0xff] }
 0x1bd   : > { %3315 = vmatmul.msk.f32.gmra.mxu3 %vm236_vm1, %v3282_v56 }
 0x1be   : > { %3380 = vmatmul.msk.f32.gmra.mxu0 %vm236_vm1, %v3981_v2 }
 0x1bf   : > { %v898_v49 = vpop.f32.mrf.mxu2 }
 0x1c0   : > { %v936_v1 = vadd.f32 %v898_v49, %v654_v31  ;;  %v1176_v57 = vpop.f32.mrf.mxu3  ;;  %v656_v30 = vpop.f32.mrf.mxu1 }
 0x1c1   : > { %v657_v5 = vadd.f32 %v656_v30, %v4755_v44 }
 0x1c2   : > { %v1214_v36 = vadd.f32 %v1176_v57, %v936_v1 }
 0x1c3   : > { %v1456_v17 = vpop.f32.mrf.mxu0  ;;  %3186 = vmatmul.msk.f32.gmra.mxu1 %vm236_vm1, %v4752_v21 }
 0x1c4   : > { %v4345_v11 = vadd.f32 %v1453_v26, %v1214_v36  ;;  %3251 = vmatmul.msk.f32.gmra.mxu2 %vm236_vm1, %v3969_v61  ;;  %v4756_v61 = vld [vmem:[#allocation31_spill] sm:$0xff] }
 0x1c5   : > { %3316 = vmatmul.msk.f32.gmra.mxu3 %vm236_vm1, %v3283_v3 }
 0x1c6   : > { %3381 = vmatmul.msk.f32.gmra.mxu0 %vm236_vm1, %v3998_v27 }
 0x1c7   : > { %v901_v39 = vpop.f32.mrf.mxu2 }
 0x1c8   : > { %v937_v20 = vadd.f32 %v901_v39, %v657_v5  ;;  %v1179_v12 = vpop.f32.mrf.mxu3  ;;  %v659_v52 = vpop.f32.mrf.mxu1 }
 0x1c9   : > { %v660_v21 = vadd.f32 %v659_v52, %v4756_v61 }
 0x1ca   : > { %v1215_v59 = vadd.f32 %v1179_v12, %v937_v20 }
 0x1cb   : > { %v1459_v54 = vpop.f32.mrf.mxu0  ;;  %3187 = vmatmul.msk.f32.gmra.mxu1 %vm236_vm1, %v3981_v2 }
 0x1cc   : > { %v4356_v35 = vadd.f32 %v1456_v17, %v1215_v59  ;;  %3252 = vmatmul.msk.f32.gmra.mxu2 %vm236_vm1, %v3984_v58  ;;  %v4757_v58 = vld [vmem:[#allocation33_spill] sm:$0xff]  ;;  %v3286_v17 = vld [vmem:[%s3527_s28 + $0xf9] sm:$0xff] }
 0x1cd   : > { %3317 = vmatmul.msk.f32.gmra.mxu3 %vm236_vm1, %v3284_v23  ;;  %v3287_v23 = vld [vmem:[%s3527_s28 + $0x109] sm:$0xff] }
 0x1ce   : > { %3382 = vmatmul.msk.f32.gmra.mxu0 %vm236_vm1, %v4015_v62 }
 0x1cf   : > { %v904_v24 = vpop.f32.mrf.mxu2 }
 0x1d0   : > { %v938_v55 = vadd.f32 %v904_v24, %v660_v21  ;;  %v1182_v48 = vpop.f32.mrf.mxu3  ;;  %v1643_v56 = vpop.f32.mrf.mxu1  ;;  %v4759_v21 = vld [vmem:[#allocation35_spill] sm:$0xff] }
 0x1d1   : > { %v1739_v49 = vadd.f32 %v1643_v56, %v4757_v58 }
 0x1d2   : > { %v1216_v26 = vadd.f32 %v1182_v48, %v938_v55 }
 0x1d3   : > { %v2475_v31 = vpop.f32.mrf.mxu0  ;;  %3188 = vmatmul.msk.f32.gmra.mxu1 %vm236_vm1, %v3998_v27 }
 0x1d4   : > { %v4367_v2 = vadd.f32 %v1459_v54, %v1216_v26  ;;  %3253 = vmatmul.msk.f32.gmra.mxu2 %vm236_vm1, %v4001_v6  ;;  %v4758_v6 = vld [vmem:[#allocation34_spill] sm:$0xff] }
 0x1d5   : > { %3318 = vmatmul.msk.f32.gmra.mxu3 %vm236_vm1, %v3285_v34 }
 0x1d6   : > { %3383 = vmatmul.msk.f32.gmra.mxu0 %vm236_vm1, %v4032_v4 }
 0x1d7   : > { %v1921_v1 = vpop.f32.mrf.mxu2 }
 0x1d8   : > { %v2017_v57 = vadd.f32 %v1921_v1, %v1739_v49  ;;  %v2198_v30 = vpop.f32.mrf.mxu3  ;;  %v1646_v36 = vpop.f32.mrf.mxu1 }
 0x1d9   : > { %v1740_v5 = vadd.f32 %v1646_v36, %v4758_v6 }
 0x1da   : > { %v2294_v3 = vadd.f32 %v2198_v30, %v2017_v57  ;;  %v3288_v57 = vld [vmem:[%s3527_s28 + $0x111] sm:$0xff] }
 0x1db   : > { %v2478_v44 = vpop.f32.mrf.mxu0  ;;  %3189 = vmatmul.msk.f32.gmra.mxu1 %vm236_vm1, %v4015_v62 }
 0x1dc   : > { %v2571_v27 = vadd.f32 %v2475_v31, %v2294_v3  ;;  %3254 = vmatmul.msk.f32.gmra.mxu2 %vm236_vm1, %v4018_v13  ;;  %v4760_v3 = vld [vmem:[#allocation36_spill] sm:$0xff] }
 0x1dd   : > { %3319 = vmatmul.msk.f32.gmra.mxu3 %vm236_vm1, %v3286_v17 }
 0x1de   : > { %3384 = vmatmul.msk.f32.gmra.mxu0 %vm236_vm1, %v4049_v16  ;;  %2603 = vst.msk [vmem:[%s4382_s15] sm:$0xff] %vm236_vm1, %v2571_v27  ;;  %v2704_v54 = vmul.f32 %v2571_v27, %v2571_v27  ;;  %v2635_v13 = vsel %vm236_vm1, %v2571_v27, 0.0 }
 0x1df   : > { %v1924_v39 = vpop.f32.mrf.mxu2 }
 0x1e0   : > { %v2018_v20 = vadd.f32 %v1924_v39, %v1740_v5  ;;  %v2201_v12 = vpop.f32.mrf.mxu3  ;;  %v1649_v52 = vpop.f32.mrf.mxu1 }
 0x1e1   : > { %v1741_v24 = vadd.f32 %v1649_v52, %v4759_v21 }
 0x1e2   : > { %v2295_v59 = vadd.f32 %v2201_v12, %v2018_v20 }
 0x1e3   : > { %v2481_v62 = vpop.f32.mrf.mxu0  ;;  %3190 = vmatmul.msk.f32.gmra.mxu1 %vm236_vm1, %v4032_v4 }
 0x1e4   : > { %v2572_v61 = vadd.f32 %v2478_v44, %v2295_v59  ;;  %3255 = vmatmul.msk.f32.gmra.mxu2 %vm236_vm1, %v4035_v14  ;;  %v2736_v14 = vsel %vm236_vm1, %v2704_v54, 0.0  ;;  %v3289_v59 = vld [vmem:[%s3527_s28 + $0x121] sm:$0xff] }
 0x1e5   : > { %3320 = vmatmul.msk.f32.gmra.mxu3 %vm236_vm1, %v3287_v23  ;;  %v4761_v54 = vld [vmem:[#allocation37_spill] sm:$0xff] }
 0x1e6   : > { %3385 = vmatmul.msk.f32.gmra.mxu0 %vm236_vm1, %v4066_v32  ;;  %2604 = vst.msk [vmem:[%s4382_s15 + $0x8] sm:$0xff] %vm236_vm1, %v2572_v61  ;;  %v2636_v55 = vsel %vm236_vm1, %v2572_v61, 0.0  ;;  %v2705_v48 = vmul.f32 %v2572_v61, %v2572_v61 }
 0x1e7   : > { %v2637_v56 = vadd.f32 %v2636_v55, %v2635_v13  ;;  %v1927_v4 = vpop.f32.mrf.mxu2 }
 0x1e8   : > { %v2737_v26 = vsel %vm236_vm1, %v2705_v48, 0.0  ;;  %v2019_v34 = vadd.f32 %v1927_v4, %v1741_v24  ;;  %v2204_v31 = vpop.f32.mrf.mxu3  ;;  %v1652_v49 = vpop.f32.mrf.mxu1 }
 0x1e9   : > { %v2738_v58 = vadd.f32 %v2737_v26, %v2736_v14  ;;  %v1742_v17 = vadd.f32 %v1652_v49, %v4760_v3  ;;  %v3290_v26 = vld [vmem:[%s3527_s28 + $0x129] sm:$0xff] }
 0x1ea   : > { %v2296_v1 = vadd.f32 %v2204_v31, %v2019_v34  ;;  %v4762_v31 = vld [vmem:[#allocation38_spill] sm:$0xff] }
 0x1eb   : > { %v2484_v30 = vpop.f32.mrf.mxu0  ;;  %3191 = vmatmul.msk.f32.gmra.mxu1 %vm236_vm1, %v4049_v16 }
 0x1ec   : > { %v2573_v36 = vadd.f32 %v2481_v62, %v2296_v1  ;;  %3256 = vmatmul.msk.f32.gmra.mxu2 %vm236_vm1, %v4052_v18 }
 0x1ed   : > { %3321 = vmatmul.msk.f32.gmra.mxu3 %vm236_vm1, %v3288_v57 }
 0x1ee   : > { %3386 = vmatmul.msk.f32.gmra.mxu0 %vm236_vm1, %v4083_v45  ;;  %2605 = vst.msk [vmem:[%s4382_s15 + $0x10] sm:$0xff] %vm236_vm1, %v2573_v36  ;;  %v2638_v44 = vsel %vm236_vm1, %v2573_v36, 0.0  ;;  %v2706_v27 = vmul.f32 %v2573_v36, %v2573_v36 }
 0x1ef   : > { %v2639_v6 = vadd.f32 %v2638_v44, %v2637_v56  ;;  %v1930_v5 = vpop.f32.mrf.mxu2  ;;  %v3161_v44 = vld [vmem:[%s3527_s28 + $0x122] sm:$0xff] }
 0x1f0   : > { %v2739_v16 = vsel %vm236_vm1, %v2706_v27, 0.0  ;;  %v2020_v39 = vadd.f32 %v1930_v5, %v1742_v17  ;;  %v2207_v20 = vpop.f32.mrf.mxu3  ;;  %v1655_v12 = vpop.f32.mrf.mxu1  ;;  %v3226_v27 = vld [vmem:[%s3527_s28 + $0x138] sm:$0xff] }
 0x1f1   : > { %v2740_v18 = vadd.f32 %v2739_v16, %v2738_v58  ;;  %v1743_v61 = vadd.f32 %v1655_v12, %v4761_v54 }
 0x1f2   : > { %v2297_v52 = vadd.f32 %v2207_v20, %v2020_v39  ;;  %v4763_v39 = vld [vmem:[#allocation39_spill] sm:$0xff] }
 0x1f3   : > { %v2487_v23 = vpop.f32.mrf.mxu0  ;;  %3192 = vmatmul.msk.f32.gmra.mxu1 %vm236_vm1, %v4066_v32 }
 0x1f4   : > { %v2574_v62 = vadd.f32 %v2484_v30, %v2297_v52  ;;  %3257 = vmatmul.msk.f32.gmra.mxu2 %vm236_vm1, %v4069_v22 }
 0x1f5   : > { %3322 = vmatmul.msk.f32.gmra.mxu3 %vm236_vm1, %v3289_v59 }
 0x1f6   : > { %3387 = vmatmul.msk.f32.gmra.mxu0 %vm236_vm1, %v4100_v0  ;;  %2606 = vst.msk [vmem:[%s4382_s15 + $0x18] sm:$0xff] %vm236_vm1, %v2574_v62  ;;  %v2640_v13 = vsel %vm236_vm1, %v2574_v62, 0.0  ;;  %v2707_v21 = vmul.f32 %v2574_v62, %v2574_v62 }
 0x1f7   : > { %v2641_v24 = vadd.f32 %v2640_v13, %v2639_v6  ;;  %v1933_v55 = vpop.f32.mrf.mxu2 }
 0x1f8   : > { %v2741_v32 = vsel %vm236_vm1, %v2707_v21, 0.0  ;;  %v2021_v48 = vadd.f32 %v1933_v55, %v1743_v61  ;;  %v2210_v56 = vpop.f32.mrf.mxu3  ;;  %v1658_v4 = vpop.f32.mrf.mxu1  ;;  %v3162_v21 = vld [vmem:[%s3527_s28 + $0x12a] sm:$0xff]  ;;  %v3292_v55 = vld [vmem:[%s3527_s28 + $0x141] sm:$0xff] }
 0x1f9   : > { %v2742_v22 = vadd.f32 %v2741_v32, %v2740_v18  ;;  %v1744_v58 = vadd.f32 %v1658_v4, %v4762_v31 }
 0x1fa   : > { %v2298_v14 = vadd.f32 %v2210_v56, %v2021_v48  ;;  %v3357_v48 = vld [vmem:[%s3527_s28 + $0x142] sm:$0xff] }
 0x1fb   : > { %v2490_v34 = vpop.f32.mrf.mxu0  ;;  %3193 = vmatmul.msk.f32.gmra.mxu1 %vm236_vm1, %v4083_v45 }
 0x1fc   : > { %v2575_v0 = vadd.f32 %v2487_v23, %v2298_v14  ;;  %3258 = vmatmul.msk.f32.gmra.mxu2 %vm236_vm1, %v4086_v29 }
 0x1fd   : > { %3323 = vmatmul.msk.f32.gmra.mxu3 %vm236_vm1, %v3290_v26 }
 0x1fe   : > { %3388 = vmatmul.msk.f32.gmra.mxu0 %vm236_vm1, %v4114_v37  ;;  %2607 = vst.msk [vmem:[%s4382_s15 + $0x20] sm:$0xff] %vm236_vm1, %v2575_v0  ;;  %v2642_v49 = vsel %vm236_vm1, %v2575_v0, 0.0  ;;  %v2708_v1 = vmul.f32 %v2575_v0, %v2575_v0  ;;  %v3291_v37 = vld [vmem:[%s3527_s28 + $0x139] sm:$0xff] }
 0x1ff   : > { %v2643_v57 = vadd.f32 %v2642_v49, %v2641_v24  ;;  %v1936_v30 = vpop.f32.mrf.mxu2  ;;  %v3227_v24 = vld [vmem:[%s3527_s28 + $0x140] sm:$0xff] }
 0x200   : > { %v2743_v45 = vsel %vm236_vm1, %v2708_v1, 0.0  ;;  %v2022_v36 = vadd.f32 %v1936_v30, %v1744_v58  ;;  %v2213_v29 = vpop.f32.mrf.mxu3  ;;  %v1661_v17 = vpop.f32.mrf.mxu1  ;;  %v3163_v30 = vld [vmem:[%s3527_s28 + $0x13a] sm:$0xff] }
 0x201   : > { %v2744_v3 = vadd.f32 %v2743_v45, %v2742_v22  ;;  %v1745_v20 = vadd.f32 %v1661_v17, %v4763_v39  ;;  %v4764_v22 = vld [vmem:[#allocation40_spill] sm:$0xff]  ;;  %v3228_v45 = vld [vmem:[%s3527_s28 + $0x150] sm:$0xff] }
 0x202   : > { %v2299_v6 = vadd.f32 %v2213_v29, %v2022_v36  ;;  %v3293_v29 = vld [vmem:[%s3527_s28 + $0x151] sm:$0xff] }
 0x203   : > { %v2493_v5 = vpop.f32.mrf.mxu0  ;;  %3194 = vmatmul.msk.f32.gmra.mxu1 %vm236_vm1, %v3161_v44  ;;  %v3358_v17 = vld [vmem:[%s3527_s28 + $0x152] sm:$0xff] }
 0x204   : > { %v2576_v16 = vadd.f32 %v2490_v34, %v2299_v6  ;;  %3259 = vmatmul.msk.f32.gmra.mxu2 %vm236_vm1, %v3226_v27  ;;  %v4765_v27 = vld [vmem:[#allocation41_spill] sm:$0xff] }
 0x205   : > { %3324 = vmatmul.msk.f32.gmra.mxu3 %vm236_vm1, %v3291_v37 }
 0x206   : > { %3389 = vmatmul.msk.f32.gmra.mxu0 %vm236_vm1, %v4128_v10  ;;  %2608 = vst.msk [vmem:[%s4382_s15 + $0x28] sm:$0xff] %vm236_vm1, %v2576_v16  ;;  %v2644_v18 = vsel %vm236_vm1, %v2576_v16, 0.0  ;;  %v2709_v12 = vmul.f32 %v2576_v16, %v2576_v16 }
 0x207   : > { %v2645_v52 = vadd.f32 %v2644_v18, %v2643_v57  ;;  %v1939_v59 = vpop.f32.mrf.mxu2 }
 0x208   : > { %v2745_v23 = vsel %vm236_vm1, %v2709_v12, 0.0  ;;  %v2023_v62 = vadd.f32 %v1939_v59, %v1745_v20  ;;  %v2216_v54 = vpop.f32.mrf.mxu3  ;;  %v1664_v13 = vpop.f32.mrf.mxu1 }
 0x209   : > { %v2746_v61 = vadd.f32 %v2745_v23, %v2744_v3  ;;  %v1746_v4 = vadd.f32 %v1664_v13, %v4764_v22  ;;  %v3229_v23 = vld [vmem:[%s3527_s28 + $0x158] sm:$0xff] }
 0x20a   : > { %v2300_v10 = vadd.f32 %v2216_v54, %v2023_v62  ;;  %v3294_v54 = vld [vmem:[%s3527_s28 + $0x159] sm:$0xff] }
 0x20b   : > { %v2496_v32 = vpop.f32.mrf.mxu0  ;;  %3195 = vmatmul.msk.f32.gmra.mxu1 %vm236_vm1, %v3162_v21  ;;  %v3359_v13 = vld [vmem:[%s3527_s28 + $0x15a] sm:$0xff] }
 0x20c   : > { %v2577_v56 = vadd.f32 %v2493_v5, %v2300_v10  ;;  %3260 = vmatmul.msk.f32.gmra.mxu2 %vm236_vm1, %v3227_v24 }
 0x20d   : > { %3325 = vmatmul.msk.f32.gmra.mxu3 %vm236_vm1, %v3292_v55 }
 0x20e   : > { %3390 = vmatmul.msk.f32.gmra.mxu0 %vm236_vm1, %v3357_v48  ;;  %2609 = vst.msk [vmem:[%s4382_s15 + $0x30] sm:$0xff] %vm236_vm1, %v2577_v56  ;;  %v2646_v14 = vsel %vm236_vm1, %v2577_v56, 0.0  ;;  %v2710_v26 = vmul.f32 %v2577_v56, %v2577_v56 }
 0x20f   : > { %v2647_v34 = vadd.f32 %v2646_v14, %v2645_v52  ;;  %v1942_v0 = vpop.f32.mrf.mxu2 }
 0x210   : > { %v2747_v31 = vsel %vm236_vm1, %v2710_v26, 0.0  ;;  %v2024_v58 = vadd.f32 %v1942_v0, %v1746_v4  ;;  %v2219_v49 = vpop.f32.mrf.mxu3  ;;  %v1667_v57 = vpop.f32.mrf.mxu1 }
 0x211   : > { %v2748_v1 = vadd.f32 %v2747_v31, %v2746_v61  ;;  %v1747_v6 = vadd.f32 %v1667_v57, %v4765_v27  ;;  %v3295_v31 = vld [vmem:[%s3527_s28 + $0x169] sm:$0xff] }
 0x212   : > { %v2301_v36 = vadd.f32 %v2219_v49, %v2024_v58  ;;  %v3360_v49 = vld [vmem:[%s3527_s28 + $0x16a] sm:$0xff] }
 0x213   : > { %v2499_v3 = vpop.f32.mrf.mxu0  ;;  %3196 = vmatmul.msk.f32.gmra.mxu1 %vm236_vm1, %v3163_v30 }
 0x214   : > { %v2578_v44 = vadd.f32 %v2496_v32, %v2301_v36  ;;  %3261 = vmatmul.msk.f32.gmra.mxu2 %vm236_vm1, %v3228_v45 }
 0x215   : > { %3326 = vmatmul.msk.f32.gmra.mxu3 %vm236_vm1, %v3293_v29 }
 0x216   : > { %3391 = vmatmul.msk.f32.gmra.mxu0 %vm236_vm1, %v3358_v17  ;;  %2610 = vst.msk [vmem:[%s4382_s15 + $0x38] sm:$0xff] %vm236_vm1, %v2578_v44  ;;  %v2648_v37 = vsel %vm236_vm1, %v2578_v44, 0.0  ;;  %v2711_v5 = vmul.f32 %v2578_v44, %v2578_v44 }
 0x217   : > { %v2649_v16 = vadd.f32 %v2648_v37, %v2647_v34  ;;  %v1945_v39 = vpop.f32.mrf.mxu2  ;;  %v3230_v34 = vld [vmem:[%s3527_s28 + $0x168] sm:$0xff] }
 0x218   : > { %v2749_v20 = vsel %vm236_vm1, %v2711_v5, 0.0  ;;  %v2025_v18 = vadd.f32 %v1945_v39, %v1747_v6  ;;  %v2222_v12 = vpop.f32.mrf.mxu3  ;;  %v1670_v59 = vpop.f32.mrf.mxu1  ;;  %v3231_v6 = vld [vmem:[%s3527_s28 + $0x170] sm:$0xff] }
 0x219   : > { %v2750_v52 = vadd.f32 %v2749_v20, %v2748_v1  ;;  %v1748_v24 = vadd.f32 %v1670_v59, %v4131_v28  ;;  %v3296_v5 = vld [vmem:[%s3527_s28 + $0x171] sm:$0xff] }
 0x21a   : > { %v2302_v62 = vadd.f32 %v2222_v12, %v2025_v18  ;;  %v3361_v39 = vld [vmem:[%s3527_s28 + $0x172] sm:$0xff] }
 0x21b   : > { %v2502_v61 = vpop.f32.mrf.mxu0  ;;  %3197 = vmatmul.msk.f32.gmra.mxu1 %vm236_vm1, %v3357_v48 }
 0x21c   : > { %v2579_v21 = vadd.f32 %v2499_v3, %v2302_v62  ;;  %3262 = vmatmul.msk.f32.gmra.mxu2 %vm236_vm1, %v3229_v23 }
 0x21d   : > { %3327 = vmatmul.msk.f32.gmra.mxu3 %vm236_vm1, %v3294_v54 }
 0x21e   : > { %3392 = vmatmul.msk.f32.gmra.mxu0 %vm236_vm1, %v3359_v13  ;;  %2611 = vst.msk [vmem:[%s4382_s15 + $0x40] sm:$0xff] %vm236_vm1, %v2579_v21  ;;  %v2650_v10 = vsel %vm236_vm1, %v2579_v21, 0.0  ;;  %v2712_v55 = vmul.f32 %v2579_v21, %v2579_v21  ;;  %v3232_v21 = vld [vmem:[%s3527_s28 + $0x180] sm:$0xff] }
 0x21f   : > { %v2651_v32 = vadd.f32 %v2650_v10, %v2649_v16  ;;  %v1948_v56 = vpop.f32.mrf.mxu2  ;;  %v3297_v10 = vld [vmem:[%s3527_s28 + $0x181] sm:$0xff] }
 0x220   : > { %v2751_v22 = vsel %vm236_vm1, %v2712_v55, 0.0  ;;  %v2026_v48 = vadd.f32 %v1948_v56, %v1748_v24  ;;  %v2225_v4 = vpop.f32.mrf.mxu3  ;;  %v1673_v26 = vpop.f32.mrf.mxu1 }
 0x221   : > { %v2752_v14 = vadd.f32 %v2751_v22, %v2750_v52  ;;  %v1749_v1 = vadd.f32 %v1673_v26, %v4142_v33 }
 0x222   : > { %v2303_v0 = vadd.f32 %v2225_v4, %v2026_v48 }
 0x223   : > { %v2505_v58 = vpop.f32.mrf.mxu0  ;;  %3198 = vmatmul.msk.f32.gmra.mxu1 %vm236_vm1, %v3358_v17 }
 0x224   : > { %v2580_v28 = vadd.f32 %v2502_v61, %v2303_v0  ;;  %3263 = vmatmul.msk.f32.gmra.mxu2 %vm236_vm1, %v3230_v34 }
 0x225   : > { %3328 = vmatmul.msk.f32.gmra.mxu3 %vm236_vm1, %v3295_v31 }
 0x226   : > { %3393 = vmatmul.msk.f32.gmra.mxu0 %vm236_vm1, %v3360_v49  ;;  %2612 = vst.msk [vmem:[%s4382_s15 + $0x48] sm:$0xff] %vm236_vm1, %v2580_v28  ;;  %v2652_v57 = vsel %vm236_vm1, %v2580_v28, 0.0  ;;  %v2713_v30 = vmul.f32 %v2580_v28, %v2580_v28 }
 0x227   : > { %v2653_v45 = vadd.f32 %v2652_v57, %v2651_v32  ;;  %v1951_v36 = vpop.f32.mrf.mxu2  ;;  %v3362_v32 = vld [vmem:[%s3527_s28 + $0x182] sm:$0xff] }
 0x228   : > { %v2753_v29 = vsel %vm236_vm1, %v2713_v30, 0.0  ;;  %v2027_v3 = vadd.f32 %v1951_v36, %v1749_v1  ;;  %v2228_v17 = vpop.f32.mrf.mxu3  ;;  %v1676_v27 = vpop.f32.mrf.mxu1  ;;  %v3298_v1 = vld [vmem:[%s3527_s28 + $0x189] sm:$0xff] }
 0x229   : > { %v2754_v44 = vadd.f32 %v2753_v29, %v2752_v14  ;;  %v1750_v20 = vadd.f32 %v1676_v27, %v4152_v38  ;;  %v3363_v30 = vld [vmem:[%s3527_s28 + $0x18a] sm:$0xff] }
 0x22a   : > { %v2304_v37 = vadd.f32 %v2228_v17, %v2027_v3 }
 0x22b   : > { %v2508_v16 = vpop.f32.mrf.mxu0  ;;  %3199 = vmatmul.msk.f32.gmra.mxu1 %vm236_vm1, %v3359_v13 }
 0x22c   : > { %v2581_v33 = vadd.f32 %v2505_v58, %v2304_v37  ;;  %3264 = vmatmul.msk.f32.gmra.mxu2 %vm236_vm1, %v3231_v6 }
 0x22d   : > { %3329 = vmatmul.msk.f32.gmra.mxu3 %vm236_vm1, %v3296_v5 }
 0x22e   : > { %3394 = vmatmul.msk.f32.gmra.mxu0 %vm236_vm1, %v3361_v39  ;;  %2613 = vst.msk [vmem:[%s4382_s15 + $0x50] sm:$0xff] %vm236_vm1, %v2581_v33  ;;  %v2654_v18 = vsel %vm236_vm1, %v2581_v33, 0.0  ;;  %v2714_v12 = vmul.f32 %v2581_v33, %v2581_v33  ;;  %v3299_v33 = vld [vmem:[%s3527_s28 + $0x199] sm:$0xff] }
 0x22f   : > { %v2655_v52 = vadd.f32 %v2654_v18, %v2653_v45  ;;  %v1954_v59 = vpop.f32.mrf.mxu2  ;;  %v3364_v18 = vld [vmem:[%s3527_s28 + $0x19a] sm:$0xff] }
 0x230   : > { %v2755_v23 = vsel %vm236_vm1, %v2714_v12, 0.0  ;;  %v2028_v62 = vadd.f32 %v1954_v59, %v1750_v20  ;;  %v2231_v54 = vpop.f32.mrf.mxu3  ;;  %v1679_v13 = vpop.f32.mrf.mxu1 }
 0x231   : > { %v2756_v61 = vadd.f32 %v2755_v23, %v2754_v44  ;;  %v1751_v56 = vadd.f32 %v1679_v13, %v4162_v19 }
 0x232   : > { %v2305_v24 = vadd.f32 %v2231_v54, %v2028_v62 }
 0x233   : > { %v2511_v55 = vpop.f32.mrf.mxu0  ;;  %3200 = vmatmul.msk.f32.gmra.mxu1 %vm236_vm1, %v3360_v49  ;;  %v3233_v49 = vld [vmem:[%s3527_s28 + $0x188] sm:$0xff] }
 0x234   : > { %v2582_v38 = vadd.f32 %v2508_v16, %v2305_v24  ;;  %3265 = vmatmul.msk.f32.gmra.mxu2 %vm236_vm1, %v3232_v21  ;;  %v3234_v16 = vld [vmem:[%s3527_s28 + $0x198] sm:$0xff] }
 0x235   : > { %3330 = vmatmul.msk.f32.gmra.mxu3 %vm236_vm1, %v3297_v10  ;;  %v3235_v10 = vld [vmem:[%s3527_s28 + $0x1a0] sm:$0xff] }
 0x236   : > { %3395 = vmatmul.msk.f32.gmra.mxu0 %vm236_vm1, %v3362_v32  ;;  %2614 = vst.msk [vmem:[%s4382_s15 + $0x58] sm:$0xff] %vm236_vm1, %v2582_v38  ;;  %v2656_v22 = vsel %vm236_vm1, %v2582_v38, 0.0  ;;  %v2715_v48 = vmul.f32 %v2582_v38, %v2582_v38 }
 0x237   : > { %v2657_v4 = vadd.f32 %v2656_v22, %v2655_v52  ;;  %v1957_v14 = vpop.f32.mrf.mxu2 }
 0x238   : > { %v2757_v26 = vsel %vm236_vm1, %v2715_v48, 0.0  ;;  %v2029_v34 = vadd.f32 %v1957_v14, %v1751_v56  ;;  %v2234_v0 = vpop.f32.mrf.mxu3  ;;  %v1682_v58 = vpop.f32.mrf.mxu1  ;;  %v3365_v56 = vld [vmem:[%s3527_s28 + $0x1a2] sm:$0xff] }
 0x239   : > { %v2758_v31 = vadd.f32 %v2757_v26, %v2756_v61  ;;  %v1752_v45 = vadd.f32 %v1682_v58, %v4173_v8 }
 0x23a   : > { %v2306_v28 = vadd.f32 %v2234_v0, %v2029_v34 }
 0x23b   : > { %v2514_v57 = vpop.f32.mrf.mxu0  ;;  %3201 = vmatmul.msk.f32.gmra.mxu1 %vm236_vm1, %v3361_v39 }
 0x23c   : > { %v2583_v19 = vadd.f32 %v2511_v55, %v2306_v28  ;;  %3266 = vmatmul.msk.f32.gmra.mxu2 %vm236_vm1, %v3233_v49 }
 0x23d   : > { %3331 = vmatmul.msk.f32.gmra.mxu3 %vm236_vm1, %v3298_v1 }
 0x23e   : > { %3396 = vmatmul.msk.f32.gmra.mxu0 %vm236_vm1, %v3363_v30  ;;  %2615 = vst.msk [vmem:[%s4382_s15 + $0x60] sm:$0xff] %vm236_vm1, %v2583_v19  ;;  %v2658_v36 = vsel %vm236_vm1, %v2583_v19, 0.0  ;;  %v2716_v29 = vmul.f32 %v2583_v19, %v2583_v19 }
 0x23f   : > { %v2659_v3 = vadd.f32 %v2658_v36, %v2657_v4  ;;  %v1960_v17 = vpop.f32.mrf.mxu2 }
 0x240   : > { %v2759_v44 = vsel %vm236_vm1, %v2716_v29, 0.0  ;;  %v2030_v27 = vadd.f32 %v1960_v17, %v1752_v45  ;;  %v2237_v6 = vpop.f32.mrf.mxu3  ;;  %v1685_v5 = vpop.f32.mrf.mxu1 }
 0x241   : > { %v2760_v37 = vadd.f32 %v2759_v44, %v2758_v31  ;;  %v1753_v12 = vadd.f32 %v1685_v5, %v4183_v25 }
 0x242   : > { %v2307_v39 = vadd.f32 %v2237_v6, %v2030_v27 }
 0x243   : > { %v2517_v20 = vpop.f32.mrf.mxu0  ;;  %3202 = vmatmul.msk.f32.gmra.mxu1 %vm236_vm1, %v3362_v32  ;;  %v3300_v32 = vld [vmem:[%s3527_s28 + $0x1a1] sm:$0xff] }
 0x244   : > { %v2584_v8 = vadd.f32 %v2514_v57, %v2307_v39  ;;  %3267 = vmatmul.msk.f32.gmra.mxu2 %vm236_vm1, %v3234_v16 }
 0x245   : > { %3332 = vmatmul.msk.f32.gmra.mxu3 %vm236_vm1, %v3299_v33 }
 0x246   : > { %3397 = vmatmul.msk.f32.gmra.mxu0 %vm236_vm1, %v3364_v18  ;;  %2616 = vst.msk [vmem:[%s4382_s15 + $0x68] sm:$0xff] %vm236_vm1, %v2584_v8  ;;  %v2660_v52 = vsel %vm236_vm1, %v2584_v8, 0.0  ;;  %v2717_v59 = vmul.f32 %v2584_v8, %v2584_v8 }
 0x247   : > { %v2661_v23 = vadd.f32 %v2660_v52, %v2659_v3  ;;  %v1963_v62 = vpop.f32.mrf.mxu2 }
 0x248   : > { %v2761_v54 = vsel %vm236_vm1, %v2717_v59, 0.0  ;;  %v2031_v61 = vadd.f32 %v1963_v62, %v1753_v12  ;;  %v2240_v13 = vpop.f32.mrf.mxu3  ;;  %v1688_v24 = vpop.f32.mrf.mxu1 }
 0x249   : > { %v2762_v21 = vadd.f32 %v2761_v54, %v2760_v37  ;;  %v1754_v22 = vadd.f32 %v1688_v24, %v4190_v41 }
 0x24a   : > { %v2308_v55 = vadd.f32 %v2240_v13, %v2031_v61 }
 0x24b   : > { %v2520_v38 = vpop.f32.mrf.mxu0  ;;  %3203 = vmatmul.msk.f32.gmra.mxu1 %vm236_vm1, %v3363_v30 }
 0x24c   : > { %v2585_v25 = vadd.f32 %v2517_v20, %v2308_v55  ;;  %3268 = vmatmul.msk.f32.gmra.mxu2 %vm236_vm1, %v3235_v10 }
 0x24d   : > { %3333 = vmatmul.msk.f32.gmra.mxu3 %vm236_vm1, %v3300_v32 }
 0x24e   : > { %3398 = vmatmul.msk.f32.gmra.mxu0 %vm236_vm1, %v3365_v56  ;;  %2617 = vst.msk [vmem:[%s4382_s15 + $0x70] sm:$0xff] %vm236_vm1, %v2585_v25  ;;  %v2662_v48 = vsel %vm236_vm1, %v2585_v25, 0.0  ;;  %v2718_v4 = vmul.f32 %v2585_v25, %v2585_v25 }
 0x24f   : > { %v2663_v14 = vadd.f32 %v2662_v48, %v2661_v23  ;;  %v1966_v26 = vpop.f32.mrf.mxu2 }
 0x250   : > { %v2763_v34 = vsel %vm236_vm1, %v2718_v4, 0.0  ;;  %v2032_v0 = vadd.f32 %v1966_v26, %v1754_v22  ;;  %v2243_v31 = vpop.f32.mrf.mxu3  ;;  %v1691_v49 = vpop.f32.mrf.mxu1 }
 0x251   : > { %v2764_v58 = vadd.f32 %v2763_v34, %v2762_v21  ;;  %v1755_v30 = vadd.f32 %v1691_v49, %v4201_v42 }
 0x252   : > { %v2309_v28 = vadd.f32 %v2243_v31, %v2032_v0 }
 0x253   : > { %v2523_v1 = vpop.f32.mrf.mxu0 }
 0x254   : > { %v2586_v57 = vadd.f32 %v2520_v38, %v2309_v28 }
 0x256   : > { %2618 = vst.msk [vmem:[%s4382_s15 + $0x78] sm:$0xff] %vm236_vm1, %v2586_v57  ;;  %v2664_v41 = vsel %vm236_vm1, %v2586_v57, 0.0  ;;  %v2719_v19 = vmul.f32 %v2586_v57, %v2586_v57 }
 0x257   : > { %v2665_v45 = vadd.f32 %v2664_v41, %v2663_v14  ;;  %v1969_v36 = vpop.f32.mrf.mxu2 }
 0x258   : > { %v2765_v29 = vsel %vm236_vm1, %v2719_v19, 0.0  ;;  %v2033_v3 = vadd.f32 %v1969_v36, %v1755_v30  ;;  %v2246_v17 = vpop.f32.mrf.mxu3  ;;  %v1694_v27 = vpop.f32.mrf.mxu1 }
 0x259   : > { %v2766_v44 = vadd.f32 %v2765_v29, %v2764_v58  ;;  %v1756_v16 = vadd.f32 %v1694_v27, %v4212_v43 }
 0x25a   : > { %v2310_v6 = vadd.f32 %v2246_v17, %v2033_v3 }
 0x25b   : > { %v2526_v37 = vpop.f32.mrf.mxu0 }
 0x25c   : > { %v2587_v5 = vadd.f32 %v2523_v1, %v2310_v6 }
 0x25e   : > { %2619 = vst.msk [vmem:[%s4382_s15 + $0x80] sm:$0xff] %vm236_vm1, %v2587_v5  ;;  %v2666_v42 = vsel %vm236_vm1, %v2587_v5, 0.0  ;;  %v2720_v39 = vmul.f32 %v2587_v5, %v2587_v5 }
 0x25f   : > { %v2667_v33 = vadd.f32 %v2666_v42, %v2665_v45  ;;  %v1972_v20 = vpop.f32.mrf.mxu2 }
 0x260   : > { %v2767_v18 = vsel %vm236_vm1, %v2720_v39, 0.0  ;;  %v2034_v8 = vadd.f32 %v1972_v20, %v1756_v16  ;;  %v2249_v12 = vpop.f32.mrf.mxu3  ;;  %v1697_v59 = vpop.f32.mrf.mxu1 }
 0x261   : > { %v2768_v52 = vadd.f32 %v2767_v18, %v2766_v44  ;;  %v1757_v61 = vadd.f32 %v1697_v59, %v4223_v46 }
 0x262   : > { %v2311_v23 = vadd.f32 %v2249_v12, %v2034_v8 }
 0x263   : > { %v2529_v62 = vpop.f32.mrf.mxu0 }
 0x264   : > { %v2588_v54 = vadd.f32 %v2526_v37, %v2311_v23 }
 0x266   : > { %2620 = vst.msk [vmem:[%s4382_s15 + $0x88] sm:$0xff] %vm236_vm1, %v2588_v54  ;;  %v2668_v43 = vsel %vm236_vm1, %v2588_v54, 0.0  ;;  %v2721_v13 = vmul.f32 %v2588_v54, %v2588_v54 }
 0x267   : > { %v2669_v21 = vadd.f32 %v2668_v43, %v2667_v33  ;;  %v1975_v24 = vpop.f32.mrf.mxu2 }
 0x268   : > { %v2769_v10 = vsel %vm236_vm1, %v2721_v13, 0.0  ;;  %v2035_v55 = vadd.f32 %v1975_v24, %v1757_v61  ;;  %v2252_v32 = vpop.f32.mrf.mxu3  ;;  %v1700_v56 = vpop.f32.mrf.mxu1 }
 0x269   : > { %v2770_v38 = vadd.f32 %v2769_v10, %v2768_v52  ;;  %v1758_v4 = vadd.f32 %v1700_v56, %v4235_v53 }
 0x26a   : > { %v2312_v25 = vadd.f32 %v2252_v32, %v2035_v55 }
 0x26b   : > { %v2532_v22 = vpop.f32.mrf.mxu0 }
 0x26c   : > { %v2589_v48 = vadd.f32 %v2529_v62, %v2312_v25 }
 0x26e   : > { %2621 = vst.msk [vmem:[%s4382_s15 + $0x90] sm:$0xff] %vm236_vm1, %v2589_v48  ;;  %v2670_v46 = vsel %vm236_vm1, %v2589_v48, 0.0  ;;  %v2722_v14 = vmul.f32 %v2589_v48, %v2589_v48 }
 0x26f   : > { %v2671_v26 = vadd.f32 %v2670_v46, %v2669_v21  ;;  %v1978_v34 = vpop.f32.mrf.mxu2 }
 0x270   : > { %v2771_v0 = vsel %vm236_vm1, %v2722_v14, 0.0  ;;  %v2036_v31 = vadd.f32 %v1978_v34, %v1758_v4  ;;  %v2255_v58 = vpop.f32.mrf.mxu3  ;;  %v1703_v28 = vpop.f32.mrf.mxu1 }
 0x271   : > { %v2772_v49 = vadd.f32 %v2771_v0, %v2770_v38  ;;  %v1759_v41 = vadd.f32 %v1703_v28, %v4246_v47 }
 0x272   : > { %v2313_v1 = vadd.f32 %v2255_v58, %v2036_v31 }
 0x273   : > { %v2535_v57 = vpop.f32.mrf.mxu0 }
 0x274   : > { %v2590_v30 = vadd.f32 %v2532_v22, %v2313_v1 }
 0x276   : > { %2622 = vst.msk [vmem:[%s4382_s15 + $0x98] sm:$0xff] %vm236_vm1, %v2590_v30  ;;  %v2672_v53 = vsel %vm236_vm1, %v2590_v30, 0.0  ;;  %v2723_v19 = vmul.f32 %v2590_v30, %v2590_v30 }
 0x277   : > { %v2673_v45 = vadd.f32 %v2672_v53, %v2671_v26  ;;  %v1981_v36 = vpop.f32.mrf.mxu2 }
 0x278   : > { %v2773_v29 = vsel %vm236_vm1, %v2723_v19, 0.0  ;;  %v2037_v3 = vadd.f32 %v1981_v36, %v1759_v41  ;;  %v2258_v17 = vpop.f32.mrf.mxu3  ;;  %v1706_v27 = vpop.f32.mrf.mxu1 }
 0x279   : > { %v2774_v44 = vadd.f32 %v2773_v29, %v2772_v49  ;;  %v1760_v16 = vadd.f32 %v1706_v27, %v4257_v15 }
 0x27a   : > { %v2314_v6 = vadd.f32 %v2258_v17, %v2037_v3 }
 0x27b   : > { %v2538_v37 = vpop.f32.mrf.mxu0 }
 0x27c   : > { %v2591_v5 = vadd.f32 %v2535_v57, %v2314_v6 }
 0x27e   : > { %2623 = vst.msk [vmem:[%s4382_s15 + $0xa0] sm:$0xff] %vm236_vm1, %v2591_v5  ;;  %v2674_v47 = vsel %vm236_vm1, %v2591_v5, 0.0  ;;  %v2724_v42 = vmul.f32 %v2591_v5, %v2591_v5 }
 0x27f   : > { %v2675_v39 = vadd.f32 %v2674_v47, %v2673_v45  ;;  %v1984_v33 = vpop.f32.mrf.mxu2 }
 0x280   : > { %v2775_v20 = vsel %vm236_vm1, %v2724_v42, 0.0  ;;  %v2038_v18 = vadd.f32 %v1984_v33, %v1760_v16  ;;  %v2261_v8 = vpop.f32.mrf.mxu3  ;;  %v1709_v52 = vpop.f32.mrf.mxu1 }
 0x281   : > { %v2776_v12 = vadd.f32 %v2775_v20, %v2774_v44  ;;  %v1761_v54 = vadd.f32 %v1709_v52, %v4268_v40 }
 0x282   : > { %v2315_v59 = vadd.f32 %v2261_v8, %v2038_v18 }
 0x283   : > { %v2541_v23 = vpop.f32.mrf.mxu0 }
 0x284   : > { %v2592_v62 = vadd.f32 %v2538_v37, %v2315_v59 }
 0x286   : > { %2624 = vst.msk [vmem:[%s4382_s15 + $0xa8] sm:$0xff] %vm236_vm1, %v2592_v62  ;;  %v2676_v15 = vsel %vm236_vm1, %v2592_v62, 0.0  ;;  %v2725_v61 = vmul.f32 %v2592_v62, %v2592_v62 }
 0x287   : > { %v2677_v43 = vadd.f32 %v2676_v15, %v2675_v39  ;;  %v1987_v13 = vpop.f32.mrf.mxu2 }
 0x288   : > { %v2777_v21 = vsel %vm236_vm1, %v2725_v61, 0.0  ;;  %v2039_v24 = vadd.f32 %v1987_v13, %v1761_v54  ;;  %v2264_v10 = vpop.f32.mrf.mxu3  ;;  %v1712_v32 = vpop.f32.mrf.mxu1 }
 0x289   : > { %v2778_v55 = vadd.f32 %v2777_v21, %v2776_v12  ;;  %v1762_v22 = vadd.f32 %v1712_v32, %v4279_v63 }
 0x28a   : > { %v2316_v38 = vadd.f32 %v2264_v10, %v2039_v24 }
 0x28b   : > { %v2544_v56 = vpop.f32.mrf.mxu0 }
 0x28c   : > { %v2593_v25 = vadd.f32 %v2541_v23, %v2316_v38 }
 0x28e   : > { %2625 = vst.msk [vmem:[%s4382_s15 + $0xb0] sm:$0xff] %vm236_vm1, %v2593_v25  ;;  %v2678_v40 = vsel %vm236_vm1, %v2593_v25, 0.0  ;;  %v2726_v48 = vmul.f32 %v2593_v25, %v2593_v25 }
 0x28f   : > { %v2679_v4 = vadd.f32 %v2678_v40, %v2677_v43  ;;  %v1990_v46 = vpop.f32.mrf.mxu2 }
 0x290   : > { %v2779_v14 = vsel %vm236_vm1, %v2726_v48, 0.0  ;;  %v2040_v26 = vadd.f32 %v1990_v46, %v1762_v22  ;;  %v2267_v34 = vpop.f32.mrf.mxu3  ;;  %v1715_v31 = vpop.f32.mrf.mxu1 }
 0x291   : > { %v2780_v0 = vadd.f32 %v2779_v14, %v2778_v55  ;;  %v1763_v1 = vadd.f32 %v1715_v31, %v4290_v51 }
 0x292   : > { %v2317_v58 = vadd.f32 %v2267_v34, %v2040_v26 }
 0x293   : > { %v2547_v49 = vpop.f32.mrf.mxu0 }
 0x294   : > { %v2594_v28 = vadd.f32 %v2544_v56, %v2317_v58 }
 0x296   : > { %2626 = vst.msk [vmem:[%s4382_s15 + $0xb8] sm:$0xff] %vm236_vm1, %v2594_v28  ;;  %v2680_v63 = vsel %vm236_vm1, %v2594_v28, 0.0  ;;  %v2727_v57 = vmul.f32 %v2594_v28, %v2594_v28 }
 0x297   : > { %v2681_v30 = vadd.f32 %v2680_v63, %v2679_v4  ;;  %v1993_v41 = vpop.f32.mrf.mxu2 }
 0x298   : > { %v2781_v53 = vsel %vm236_vm1, %v2727_v57, 0.0  ;;  %v2041_v19 = vadd.f32 %v1993_v41, %v1763_v1  ;;  %v2270_v45 = vpop.f32.mrf.mxu3  ;;  %v1718_v29 = vpop.f32.mrf.mxu1 }
 0x299   : > { %v2782_v36 = vadd.f32 %v2781_v53, %v2780_v0  ;;  %v1764_v27 = vadd.f32 %v1718_v29, %v4301_v9 }
 0x29a   : > { %v2318_v3 = vadd.f32 %v2270_v45, %v2041_v19 }
 0x29b   : > { %v2550_v17 = vpop.f32.mrf.mxu0 }
 0x29c   : > { %v2595_v44 = vadd.f32 %v2547_v49, %v2318_v3 }
 0x29e   : > { %2627 = vst.msk [vmem:[%s4382_s15 + $0xc0] sm:$0xff] %vm236_vm1, %v2595_v44  ;;  %v2682_v51 = vsel %vm236_vm1, %v2595_v44, 0.0  ;;  %v2728_v6 = vmul.f32 %v2595_v44, %v2595_v44 }
 0x29f   : > { %v2683_v37 = vadd.f32 %v2682_v51, %v2681_v30  ;;  %v1996_v5 = vpop.f32.mrf.mxu2 }
 0x2a0   : > { %v2783_v16 = vsel %vm236_vm1, %v2728_v6, 0.0  ;;  %v2042_v47 = vadd.f32 %v1996_v5, %v1764_v27  ;;  %v2273_v42 = vpop.f32.mrf.mxu3  ;;  %v1721_v33 = vpop.f32.mrf.mxu1 }
 0x2a1   : > { %v2784_v39 = vadd.f32 %v2783_v16, %v2782_v36  ;;  %v1765_v12 = vadd.f32 %v1721_v33, %v4312_v50 }
 0x2a2   : > { %v2319_v20 = vadd.f32 %v2273_v42, %v2042_v47 }
 0x2a3   : > { %v2553_v18 = vpop.f32.mrf.mxu0 }
 0x2a4   : > { %v2596_v8 = vadd.f32 %v2550_v17, %v2319_v20 }
 0x2a6   : > { %2628 = vst.msk [vmem:[%s4382_s15 + $0xc8] sm:$0xff] %vm236_vm1, %v2596_v8  ;;  %v2684_v9 = vsel %vm236_vm1, %v2596_v8, 0.0  ;;  %v2729_v52 = vmul.f32 %v2596_v8, %v2596_v8 }
 0x2a7   : > { %v2685_v59 = vadd.f32 %v2684_v9, %v2683_v37  ;;  %v1999_v23 = vpop.f32.mrf.mxu2 }
 0x2a8   : > { %v2785_v62 = vsel %vm236_vm1, %v2729_v52, 0.0  ;;  %v2043_v54 = vadd.f32 %v1999_v23, %v1765_v12  ;;  %v2276_v15 = vpop.f32.mrf.mxu3  ;;  %v1724_v43 = vpop.f32.mrf.mxu1 }
 0x2a9   : > { %v2786_v61 = vadd.f32 %v2785_v62, %v2784_v39  ;;  %v1766_v10 = vadd.f32 %v1724_v43, %v4323_v60 }
 0x2aa   : > { %v2320_v13 = vadd.f32 %v2276_v15, %v2043_v54 }
 0x2ab   : > { %v2556_v21 = vpop.f32.mrf.mxu0 }
 0x2ac   : > { %v2597_v24 = vadd.f32 %v2553_v18, %v2320_v13 }
 0x2ae   : > { %2629 = vst.msk [vmem:[%s4382_s15 + $0xd0] sm:$0xff] %vm236_vm1, %v2597_v24  ;;  %v2686_v50 = vsel %vm236_vm1, %v2597_v24, 0.0  ;;  %v2730_v55 = vmul.f32 %v2597_v24, %v2597_v24 }
 0x2af   : > { %v2687_v32 = vadd.f32 %v2686_v50, %v2685_v59  ;;  %v2002_v38 = vpop.f32.mrf.mxu2 }
 0x2b0   : > { %v2787_v56 = vsel %vm236_vm1, %v2730_v55, 0.0  ;;  %v2044_v25 = vadd.f32 %v2002_v38, %v1766_v10  ;;  %v2279_v22 = vpop.f32.mrf.mxu3  ;;  %v1727_v48 = vpop.f32.mrf.mxu1 }
 0x2b1   : > { %v2788_v40 = vadd.f32 %v2787_v56, %v2786_v61  ;;  %v1767_v26 = vadd.f32 %v1727_v48, %v4334_v7 }
 0x2b2   : > { %v2321_v4 = vadd.f32 %v2279_v22, %v2044_v25 }
 0x2b3   : > { %v2559_v46 = vpop.f32.mrf.mxu0 }
 0x2b4   : > { %v2598_v14 = vadd.f32 %v2556_v21, %v2321_v4 }
 0x2b6   : > { %2630 = vst.msk [vmem:[%s4382_s15 + $0xd8] sm:$0xff] %vm236_vm1, %v2598_v14  ;;  %v2688_v60 = vsel %vm236_vm1, %v2598_v14, 0.0  ;;  %v2731_v34 = vmul.f32 %v2598_v14, %v2598_v14 }
 0x2b7   : > { %v2689_v0 = vadd.f32 %v2688_v60, %v2687_v32  ;;  %v2005_v31 = vpop.f32.mrf.mxu2 }
 0x2b8   : > { %v2789_v58 = vsel %vm236_vm1, %v2731_v34, 0.0  ;;  %v2045_v49 = vadd.f32 %v2005_v31, %v1767_v26  ;;  %v2282_v28 = vpop.f32.mrf.mxu3  ;;  %v1730_v63 = vpop.f32.mrf.mxu1 }
 0x2b9   : > { %v2790_v1 = vadd.f32 %v2789_v58, %v2788_v40  ;;  %v1768_v53 = vadd.f32 %v1730_v63, %v4345_v11 }
 0x2ba   : > { %v2322_v57 = vadd.f32 %v2282_v28, %v2045_v49 }
 0x2bb   : > { %v2562_v41 = vpop.f32.mrf.mxu0 }
 0x2bc   : > { %v2599_v30 = vadd.f32 %v2559_v46, %v2322_v57 }
 0x2be   : > { %2631 = vst.msk [vmem:[%s4382_s15 + $0xe0] sm:$0xff] %vm236_vm1, %v2599_v30  ;;  %v2690_v7 = vsel %vm236_vm1, %v2599_v30, 0.0  ;;  %v2732_v19 = vmul.f32 %v2599_v30, %v2599_v30 }
 0x2bf   : > { %v2691_v45 = vadd.f32 %v2690_v7, %v2689_v0  ;;  %v2008_v36 = vpop.f32.mrf.mxu2 }
 0x2c0   : > { %v2791_v29 = vsel %vm236_vm1, %v2732_v19, 0.0  ;;  %v2046_v3 = vadd.f32 %v2008_v36, %v1768_v53  ;;  %v2285_v17 = vpop.f32.mrf.mxu3  ;;  %v1733_v27 = vpop.f32.mrf.mxu1 }
 0x2c1   : > { %v2792_v44 = vadd.f32 %v2791_v29, %v2790_v1  ;;  %v1769_v37 = vadd.f32 %v1733_v27, %v4356_v35 }
 0x2c2   : > { %v2323_v51 = vadd.f32 %v2285_v17, %v2046_v3 }
 0x2c3   : > { %v2565_v42 = vpop.f32.mrf.mxu0 }
 0x2c4   : > { %v2600_v6 = vadd.f32 %v2562_v41, %v2323_v51 }
 0x2c6   : > { %2632 = vst.msk [vmem:[%s4382_s15 + $0xe8] sm:$0xff] %vm236_vm1, %v2600_v6  ;;  %v2692_v11 = vsel %vm236_vm1, %v2600_v6, 0.0  ;;  %v2733_v5 = vmul.f32 %v2600_v6, %v2600_v6 }
 0x2c7   : > { %v2693_v16 = vadd.f32 %v2692_v11, %v2691_v45  ;;  %v2011_v47 = vpop.f32.mrf.mxu2 }
 0x2c8   : > { %v2793_v39 = vsel %vm236_vm1, %v2733_v5, 0.0  ;;  %v2047_v33 = vadd.f32 %v2011_v47, %v1769_v37  ;;  %v2288_v20 = vpop.f32.mrf.mxu3  ;;  %v1736_v12 = vpop.f32.mrf.mxu1 }
 0x2c9   : > { %v2794_v18 = vadd.f32 %v2793_v39, %v2792_v44  ;;  %v1770_v52 = vadd.f32 %v1736_v12, %v4367_v2 }
 0x2ca   : > { %v2324_v8 = vadd.f32 %v2288_v20, %v2047_v33 }
 0x2cb   : > { %v2568_v13 = vpop.f32.mrf.mxu0 }
 0x2cc   : > { %v2601_v9 = vadd.f32 %v2565_v42, %v2324_v8 }
 0x2ce   : > { %2633 = vst.msk [vmem:[%s4382_s15 + $0xf0] sm:$0xff] %vm236_vm1, %v2601_v9  ;;  %v2694_v35 = vsel %vm236_vm1, %v2601_v9, 0.0  ;;  %v2734_v59 = vmul.f32 %v2601_v9, %v2601_v9 }
 0x2cf   : > { %v2695_v23 = vadd.f32 %v2694_v35, %v2693_v16  ;;  %v2014_v62 = vpop.f32.mrf.mxu2 }
 0x2d0   : > { %v2795_v54 = vsel %vm236_vm1, %v2734_v59, 0.0  ;;  %v2048_v15 = vadd.f32 %v2014_v62, %v1770_v52  ;;  %v2291_v61 = vpop.f32.mrf.mxu3 }
 0x2d1   : > { %v2796_v43 = vadd.f32 %v2795_v54, %v2794_v18 }
 0x2d2   : > { %v2325_v21 = vadd.f32 %v2291_v61, %v2048_v15 }
 0x2d4   : > { %v2602_v24 = vadd.f32 %v2568_v13, %v2325_v21 }
 0x2d6   : > { %2634 = vst.msk [vmem:[%s4382_s15 + $0xf8] sm:$0xff] %vm236_vm1, %v2602_v24  ;;  %v2696_v10 = vsel %vm236_vm1, %v2602_v24, 0.0  ;;  %v2735_v2 = vmul.f32 %v2602_v24, %v2602_v24 }
 0x2d7   : > { %v2697_v50 = vadd.f32 %v2696_v10, %v2695_v23 }
 0x2d8   : > { %v2797_v55 = vsel %vm236_vm1, %v2735_v2, 0.0 }
 0x2d9   : > { %v2698_v32 = vrot.slane %v2697_v50, 4  ;;  %v2798_v38 = vadd.f32 %v2797_v55, %v2796_v43 }
 0x2db   : > { %v2699_v56 = vadd.f32 %v2698_v32, %v2697_v50  ;;  %v2799_v25 = vrot.slane %v2798_v38, 4 }
 0x2dd   : > { %v2700_v22 = vrot.slane %v2699_v56, 2  ;;  %v2800_v40 = vadd.f32 %v2799_v25, %v2798_v38 }
 0x2df   : > { %v2701_v48 = vadd.f32 %v2700_v22, %v2699_v56  ;;  %v2801_v4 = vrot.slane %v2800_v40, 2 }
 0x2e1   : > { %v2702_v46 = vrot.slane %v2701_v48, 1  ;;  %v2802_v14 = vadd.f32 %v2801_v4, %v2800_v40 }
 0x2e3   : > { %v2803_v26 = vrot.slane %v2802_v14, 1  ;;  %v2703_v60 = vadd.f32 %v2702_v46, %v2701_v48  ;;  %2810 = sbr.rel (%p3399_p4) target bundleno = 746 (0x2ea), region = 32 }
 0x2e5   : > { %v2804_v34 = vadd.f32 %v2803_v26, %v2802_v14 }
 0x2e7   : > { %v2806_v0 = vsel %vm2805_vm2, %v2703_v60, %v2804_v34 }
 0x2e8   : > { %vm2811_vm3 = vcmask 25600  }
 0x2e9   : > { %2812 = vst.msk [vmem:[#allocation2] sm:$0x3] %vm2811_vm3, %v2806_v0 }
 0x2ea PF: > { %p3400_p5 = scmp.eq.s32.totalorder %s3492_s13, 0 }
 0x2ec   : > { %2816 = sbr.rel (%p3400_p5) target bundleno = 757 (0x2f5), region = 36 }
 0x2f1   : > { %v2817_v31 = vld [vmem:[#allocation2] sm:$0x3]  ;;  %vm2819_vm4 = vcmask 25600  }
 0x2f2   : > { %v2818_v58 = vadd.f32 %v2817_v31, %v2806_v0 }
 0x2f4   : > { %2820 = vst.msk [vmem:[#allocation2] sm:$0x3] %vm2819_vm4, %v2818_v58 }
 0x2f5 PF: > { %p3414_p6 = scmp.eq.s32.totalorder %s3492_s13, 1  ;;  %s2837_s18 = sshll.u32 %s4667_s3, 4  ;;  %s2838_s18 = int_to_ptr.hbm [resolvable:$true] %s2837_s18 }
 0x2f6   : > { %s3465_s19 = smov [#allocation2]  }
 0x2f7   : > { %s2835_s20 = sshll.u32 %s3465_s19, 4  ;;  %s2836_s20 = int_to_ptr.vmem [resolvable:$true] %s2835_s20 }
 0x2f8   : > { %3411 = dma.vmem_to_hbm [thread:$0]  (%p3414_p6), %s2836_s20, 32, %s2838_s18, [#allocation3]  }
 0x2f9   : > { %3458 = dma.done.wait (%p3414_p6), [#allocation3], 32  }
 0x2fa   : > { %3460 = vsyncadd (%p3414_p6), [#allocation3], 4294967264 }
 0x2fb PF: > { %s15_s12 = sadd.s32 1, %s3463_s12  }
 0x2fc   : > { %p12_p7 = scmp.ge.s32.totalorder %s15_s12, 4  }
 0x2fe   :  { %14 = sbr.rel (!%p12_p7) target bundleno = 1 (0x1), region = 77 }
 0x303   :  { %2859 = vsyncpa [#allocation3], 1 }
 0x304   :  { %2861 = vsyncpa [#allocation3 + $0x1], 1 }

</bundles_post_ra>
